<compile_context>
chip_gen: v7x
topology: tpu7x:2x2x1
jax: 0.10.0
libtpu: 0.0.40
codegen_flags: <defaults>
</compile_context>

<pallas_src>
import functools
import math

import jax
import jax.numpy as jnp
import numpy as np
from jax.experimental import pallas as pl
from jax.experimental.pallas import tpu as pltpu

_BN_EPS = 1e-5
_BN_SCALE = 1.0 / math.sqrt(1.0 + _BN_EPS)

_M_CHUNK_LO = 2048            # preferred minimum flat-output extent per grid step
_M_CHUNK_HI = 4608            # cap on flat-output extent per grid step
_VMEM_LIMIT_BYTES = 48 * 1024 * 1024


def _round_up(x, m):
    return ((x + m - 1) // m) * m


# ---------------------------------------------------------------------------
# Fused direct-convolution Pallas kernel (stride 1, flattened-spatial layout)
# ---------------------------------------------------------------------------
def _direct_conv_kernel(*refs, taps, relu, has_res):
    """out[co, m] = sum_t W[t, co, :] @ x[:, m + taps[t]]  (+res) (+ReLU)."""
    if has_res:
        x_ref, w_ref, r_ref, o_ref = refs
    else:
        x_ref, w_ref, o_ref = refs
        r_ref = None
    mo = o_ref.shape[-1]
    o_ref[...] = jnp.dot(w_ref[0], x_ref[:, taps[0]:taps[0] + mo],
                         preferred_element_type=jnp.float32)
    for t in range(1, len(taps)):
        o_ref[...] += jnp.dot(w_ref[t], x_ref[:, taps[t]:taps[t] + mo],
                              preferred_element_type=jnp.float32)
    if has_res:
        o_ref[...] += r_ref[...]
    if relu:
        o_ref[...] = jnp.maximum(o_ref[...], 0.0)


def _direct_conv(x, w, *, pads, dilation, relu, residual):
    """Stride-1 convolution via the fused Pallas kernel.

    x: (N, C, *S) f32.  w: (Cout, C, *K) f32 (BN scale already folded in).
    pads: per-spatial-dim (lo, hi).  residual: None or (N, Cout, *O) added
    before the optional fused ReLU.  Returns (N, Cout, *O) f32.
    """
    N, C = x.shape[0], x.shape[1]
    S = tuple(x.shape[2:])
    nsp = len(S)
    Cout = w.shape[0]
    K = tuple(w.shape[2:])
    d = dilation

    P = [S[i] + pads[i][0] + pads[i][1] for i in range(nsp)]
    O = [P[i] - d * (K[i] - 1) for i in range(nsp)]
    strides = [1] * nsp
    for i in range(nsp - 2, -1, -1):
        strides[i] = strides[i + 1] * P[i + 1]
    inner = strides[0]

    # output-channel padding / blocking (Cout sits on sublanes)
    cout_p = _round_up(Cout, 8) if Cout <= 32 else _round_up(Cout, 32)
    cb = cout_p if cout_p <= 32 else 32
    KK = int(np.prod(K))

    # weight -> (KK, cout_p, C) bf16, tap order == np.ndindex(*K)
    w2 = jnp.transpose(w, tuple(range(2, 2 + nsp)) + (0, 1)).reshape(KK, Cout, C)
    w2 = jnp.pad(w2, ((0, 0), (0, cout_p - Cout), (0, 0))).astype(jnp.bfloat16)
    taps = tuple(int(sum(t[i] * d * strides[i] for i in range(nsp)))
                 for t in np.ndindex(*K))

    # chunk the output along the outermost spatial dim: bounds the lane extent
    # of one grid step and creates >=2 parallel steps where the shape allows.
    # TODO(synk): very large volumes (realistic maxDisp) would additionally
    # want halo-window DMA tiling instead of per-chunk row re-reads.
    RC = O[0]
    for cand in range(O[0] // 2, 0, -1):
        m = cand * inner
        if O[0] % cand == 0 and _M_CHUNK_LO <= m <= _M_CHUNK_HI:
            RC = cand
            break
    if RC == O[0] and O[0] * inner > _M_CHUNK_HI:
        RC = 1
        for cand in range(O[0], 0, -1):
            if O[0] % cand == 0 and cand * inner <= _M_CHUNK_HI:
                RC = cand
                break
    n_chunks = O[0] // RC
    halo0 = d * (K[0] - 1)
    p0c = RC + halo0

    m_base = RC * inner
    m_pad = _round_up(m_base, 128)                    # lane-dense output extent
    max_off = sum((K[i] - 1) * d * strides[i] for i in range(nsp))
    need = m_pad + max_off
    extra0 = 0
    if need > p0c * inner:
        extra0 = -(-(need - p0c * inner) // inner)
    Lc = (p0c + extra0) * inner

    # pad + cast the input once (single HBM pass; no im2col inflation)
    pad_cfg = [(0, 0), (0, 0)] + [tuple(pads[i]) for i in range(nsp)]
    xp_all = jnp.pad(x, pad_cfg).astype(jnp.bfloat16)          # (N, C, *P)

    kernel = functools.partial(_direct_conv_kernel, taps=taps, relu=relu,
                               has_res=residual is not None)
    in_specs = [pl.BlockSpec((None, C, Lc), lambda q, j: (q, 0, 0)),
                pl.BlockSpec((KK, cb, C), lambda q, j: (0, j, 0))]
    if residual is not None:
        in_specs.append(pl.BlockSpec((None, cb, m_pad), lambda q, j: (q, j, 0)))
    out_spec = pl.BlockSpec((None, cb, m_pad), lambda q, j: (q, j, 0))

    results = []
    for n in range(N):
        xe = xp_all[n]                                          # (C, *P)
        if extra0:
            xe = jnp.pad(xe, [(0, 0), (0, extra0)] + [(0, 0)] * (nsp - 1))
        xcs = jnp.stack(
            [jax.lax.slice_in_dim(xe, c * RC, c * RC + p0c + extra0, axis=1)
             for c in range(n_chunks)], axis=0)
        xcs = xcs.reshape(n_chunks, C, Lc)

        args = [xcs, w2]
        if residual is not None:
            r = residual[n]                                     # (Cout, *O)
            pad_r = [(0, cout_p - Cout), (0, 0)] + \
                    [(0, P[i] - O[i]) for i in range(1, nsp)]
            r = jnp.pad(r, pad_r)                               # (cout_p, O0, P1..)
            r = r.reshape(cout_p, n_chunks, m_base)
            r = jnp.transpose(r, (1, 0, 2))
            if m_pad > m_base:
                r = jnp.pad(r, ((0, 0), (0, 0), (0, m_pad - m_base)))
            args.append(r)

        out = pl.pallas_call(
            kernel,
            out_shape=jax.ShapeDtypeStruct((n_chunks, cout_p, m_pad), jnp.float32),
            grid=(n_chunks, cout_p // cb),
            in_specs=in_specs,
            out_specs=out_spec,
            compiler_params=pltpu.CompilerParams(
                dimension_semantics=("parallel", "parallel"),
                vmem_limit_bytes=_VMEM_LIMIT_BYTES),
        )(*args)

        out = out[:, :, :m_base]
        out = jnp.transpose(out, (1, 0, 2)).reshape((cout_p, O[0]) + tuple(P[1:]))
        sl = (slice(0, Cout), slice(None)) + \
             tuple(slice(0, O[i]) for i in range(1, nsp))
        results.append(out[sl])
    return jnp.stack(results, axis=0)


# ---------------------------------------------------------------------------
# Stride-2 convolutions as stride-1 parity convolutions (no wasted taps)
# ---------------------------------------------------------------------------
def _parity_split(x, w, padding):
    """Rewrite a stride-2, kernel-3^n conv as a stride-1, kernel-2^n conv over
    a parity-stacked (channel-major) input."""
    nsp = x.ndim - 2
    pad_cfg = [(0, 0), (0, 0)]
    for i in range(nsp):
        s = x.shape[2 + i]
        pad_cfg.append((padding, padding + ((s + 2 * padding) % 2)))
    xp = jnp.pad(x, pad_cfg)

    subs, wparts = [], []
    for par in np.ndindex(*([2] * nsp)):
        sl = (slice(None), slice(None)) + tuple(slice(p, None, 2) for p in par)
        subs.append(xp[sl])
        wsub = w
        mask = np.ones((2,) * nsp, dtype=np.float32)
        for i in range(nsp):
            k = w.shape[2 + i]                                  # == 3
            idx = np.array([min(2 * ta + par[i], k - 1) for ta in range(2)])
            val = np.array([1.0 if 2 * ta + par[i] <= k - 1 else 0.0
                            for ta in range(2)], dtype=np.float32)
            wsub = jnp.take(wsub, idx, axis=2 + i)
            shp = [1] * nsp
            shp[i] = 2
            mask = mask * val.reshape(shp)
        wparts.append(wsub * jnp.asarray(mask, w.dtype))
    xs = jnp.concatenate(subs, axis=1)
    w2 = jnp.concatenate(wparts, axis=1)
    return xs, w2


def _deconv_subkernels(w):
    """ConvTranspose3d(k=3, stride=2, pad=1, out_pad=1) rewritten as a single
    stride-1 2x2x2 convolution with 8 output-parity groups stacked on Cout.
    w: (Cin, Cout, 3, 3, 3) (PyTorch ConvTranspose layout)."""
    sel_idx = (np.array([1, 0]), np.array([2, 0]))
    sel_val = (np.array([1.0, 0.0]), np.array([1.0, 1.0]))
    parts = []
    for a in range(2):
        for b in range(2):
            for c in range(2):
                sub = w[:, :, sel_idx[a], :, :]
                sub = sub[:, :, :, sel_idx[b], :]
                sub = sub[:, :, :, :, sel_idx[c]]
                mask = (sel_val[a][:, None, None] * sel_val[b][None, :, None]
                        * sel_val[c][None, None, :])
                sub = sub * jnp.asarray(mask, w.dtype)
                parts.append(jnp.transpose(sub, (1, 0, 2, 3, 4)))
    return jnp.concatenate(parts, axis=0)                        # (8*Cout, Cin, 2,2,2)


# ---------------------------------------------------------------------------
# Convolution wrappers (jit-cached per shape; BN scale folded into weights)
# ---------------------------------------------------------------------------
@functools.partial(jax.jit, static_argnames=("stride", "padding", "dilation",
                                             "relu", "scale"))
def conv2d(x, w, residual=None, *, stride=1, padding=0, dilation=1,
           relu=False, scale=1.0):
    if scale != 1.0:
        w = w * scale
    if stride == 1:
        pads = ((padding, padding), (padding, padding))
        return _direct_conv(x, w, pads=pads, dilation=dilation, relu=relu,
                            residual=residual)
    if w.shape[2] == 1:                     # 1x1 strided conv == subsample + 1x1
        xs = x[:, :, ::stride, ::stride]
        return _direct_conv(xs, w, pads=((0, 0), (0, 0)), dilation=1,
                            relu=relu, residual=residual)
    assert stride == 2 and dilation == 1 and w.shape[2] == 3
    xs, w2 = _parity_split(x, w, padding)
    return _direct_conv(xs, w2, pads=((0, 0), (0, 0)), dilation=1,
                        relu=relu, residual=residual)


@functools.partial(jax.jit, static_argnames=("stride", "padding", "dilation",
                                             "relu", "scale"))
def conv3d(x, w, residual=None, *, stride=1, padding=0, dilation=1,
           relu=False, scale=1.0):
    if scale != 1.0:
        w = w * scale
    if stride == 1:
        pads = ((padding, padding),) * 3
        return _direct_conv(x, w, pads=pads, dilation=dilation, relu=relu,
                            residual=residual)
    assert stride == 2 and dilation == 1 and w.shape[2] == 3
    xs, w2 = _parity_split(x, w, padding)
    return _direct_conv(xs, w2, pads=((0, 0),) * 3, dilation=1,
                        relu=relu, residual=residual)


@functools.partial(jax.jit, static_argnames=("scale",))
def conv_transpose3d(x, w, *, scale=1.0):
    """ConvTranspose3d(kernel=3, stride=2, padding=1, output_padding=1,
    bias=False) computed sub-pixel style (no zero-stuffed volume)."""
    cout = w.shape[1]
    wsub = _deconv_subkernels(w)
    if scale != 1.0:
        wsub = wsub * scale
    y = _direct_conv(x, wsub, pads=((0, 1), (0, 1), (0, 1)), dilation=1,
                     relu=False, residual=None)                  # (N, 8*cout, D, H, W)
    n, _, dd, hh, ww = y.shape
    y = y.reshape(n, 2, 2, 2, cout, dd, hh, ww)
    y = jnp.transpose(y, (0, 4, 5, 1, 6, 2, 7, 3))
    return y.reshape(n, cout, 2 * dd, 2 * hh, 2 * ww)


def cb2d(x, w, stride, padding, dilation, relu=False, residual=None):
    pad = dilation if dilation > 1 else padding                  # CB2D padding rule
    return conv2d(x, w, residual, stride=stride, padding=pad, dilation=dilation,
                  relu=relu, scale=_BN_SCALE)


def cb3d(x, w, stride, padding, relu=False, residual=None):
    return conv3d(x, w, residual, stride=stride, padding=padding, dilation=1,
                  relu=relu, scale=_BN_SCALE)


# ---------------------------------------------------------------------------
# Softmax-over-disparity + regression (fused Pallas kernel)
# ---------------------------------------------------------------------------
def _softmax_reg_kernel(x_ref, o_ref):
    x = x_ref[...]                                               # (MD, TH, W)
    m = jnp.max(x, axis=0, keepdims=True)
    e = jnp.exp(x - m)
    s = jnp.sum(e, axis=0)
    d = jax.lax.broadcasted_iota(jnp.float32, x.shape, 0)
    o_ref[...] = jnp.sum(e * d, axis=0) * pl.reciprocal(s, approx=True)


def _softmax_disp_regression_impl(x):
    # x: (B, maxDisp, H, W) -> (B, H, W)
    B, MD, H, W = x.shape
    TH = H
    for cand in (H // 2, H // 4, H // 8):
        if cand >= 8 and H % cand == 0 and MD * cand * W * 4 <= 4 * 1024 * 1024:
            TH = cand
            break
    return pl.pallas_call(
        _softmax_reg_kernel,
        out_shape=jax.ShapeDtypeStruct((B, H, W), jnp.float32),
        grid=(B, H // TH),
        in_specs=[pl.BlockSpec((None, MD, TH, W), lambda b, h: (b, 0, h, 0))],
        out_specs=pl.BlockSpec((None, TH, W), lambda b, h: (b, h, 0)),
        compiler_params=pltpu.CompilerParams(
            dimension_semantics=("parallel", "parallel"),
            vmem_limit_bytes=_VMEM_LIMIT_BYTES),
    )(x)


softmax_disp_regression = jax.jit(_softmax_disp_regression_impl)
# TODO(synk): the disparity-axis upsample of the trilinear resize could also be
# fused into this kernel for large maxDisp.


# ---------------------------------------------------------------------------
# Small helpers (glue)
# ---------------------------------------------------------------------------
def avg_pool2d(x, k):
    N, C, H, W = x.shape
    assert H % k == 0 and W % k == 0
    return x.reshape(N, C, H // k, k, W // k, k).mean(axis=(3, 5))


def _interp_linear_axis(x, out_size, axis):
    """1-D linear interpolation with align_corners=False (PyTorch semantics)."""
    in_size = x.shape[axis]
    if in_size == out_size:
        return x
    scale = in_size / out_size
    dst = jnp.arange(out_size, dtype=jnp.float32)
    src = jnp.clip((dst + 0.5) * scale - 0.5, 0.0, float(in_size - 1))
    i0 = jnp.floor(src).astype(jnp.int32)
    i1 = jnp.minimum(i0 + 1, in_size - 1)
    w1 = src - i0.astype(jnp.float32)
    w0 = 1.0 - w1
    shp = [1] * x.ndim
    shp[axis] = out_size
    return (jnp.take(x, i0, axis=axis) * w0.reshape(shp)
            + jnp.take(x, i1, axis=axis) * w1.reshape(shp))


def bilinear_resize(x, size):
    x = _interp_linear_axis(x, size[0], 2)
    return _interp_linear_axis(x, size[1], 3)


def trilinear_resize(x, size):
    x = _interp_linear_axis(x, size[0], 2)
    x = _interp_linear_axis(x, size[1], 3)
    return _interp_linear_axis(x, size[2], 4)


@functools.partial(jax.jit, static_argnames=("num_disp",))
def build_cost_volume(ref_f, tgt_f, *, num_disp):
    """Fused cost-volume construction (replaces the per-disparity set loop)."""
    B, C, H, W = ref_f.shape
    d_idx = jnp.arange(num_disp, dtype=jnp.int32)[:, None]
    w_idx = jnp.arange(W, dtype=jnp.int32)[None, :]
    mask = (w_idx >= d_idx).astype(ref_f.dtype)                  # (D, W)
    ref_part = ref_f[:, :, None, :, :] * mask[None, None, :, None, :]
    shifted = [tgt_f if d == 0
               else jnp.pad(tgt_f[:, :, :, :W - d],
                            ((0, 0), (0, 0), (0, 0), (d, 0)))
               for d in range(num_disp)]
    tgt_part = jnp.stack(shifted, axis=2)
    return jnp.concatenate([ref_part, tgt_part], axis=1)


# ---------------------------------------------------------------------------
# Parameters (deterministic synthetic weights)
# ---------------------------------------------------------------------------
class _ParamGen:
    def __init__(self, key):
        self._key = key

    def conv(self, shape):
        self._key, sub = jax.random.split(self._key)
        fan_in = int(np.prod(shape[1:]))
        return (0.5 / math.sqrt(fan_in)) * jax.random.normal(
            sub, shape, dtype=jnp.float32)


def make_psmnet_params(key, in_channels, feat_channels):
    g = _ParamGen(key)
    C = feat_channels

    def fel_params(cin, cout, n_blocks, stride):
        fp = {}
        if stride != 1 or cin != cout:
            fp['ft'] = g.conv((cout, cin, 1, 1))                 # 1x1 feature transformer
        blocks = [{'c1': g.conv((cout, cin, 3, 3)),
                   'c2': g.conv((cout, cout, 3, 3))}]
        for _ in range(n_blocks - 1):
            blocks.append({'c1': g.conv((cout, cout, 3, 3)),
                           'c2': g.conv((cout, cout, 3, 3))})
        fp['blocks'] = blocks
        return fp

    fe = {
        'pre': [g.conv((C, in_channels, 3, 3)),
                g.conv((C, C, 3, 3)),
                g.conv((C, C, 3, 3))],
        'fe1': fel_params(C, C, 3, 1),
        'fe2': fel_params(C, 2 * C, 16, 2),
        'fe3': fel_params(2 * C, 4 * C, 3, 1),
        'fe4': fel_params(4 * C, 4 * C, 3, 1),
        'spp1': g.conv((C, 4 * C, 1, 1)),
        'post1': g.conv((128, 10 * C, 3, 3)),
        'post2': g.conv((C, 128, 1, 1)),
    }

    def hourglass_params(c):
        return {'c1': g.conv((2 * c, c, 3, 3, 3)),
                'c2': g.conv((2 * c, 2 * c, 3, 3, 3)),
                'c3': g.conv((2 * c, 2 * c, 3, 3, 3)),
                'c4': g.conv((2 * c, 2 * c, 3, 3, 3)),
                'c5': g.conv((2 * c, 2 * c, 3, 3, 3)),           # ConvTranspose3d (Cin,Cout,...)
                'c6': g.conv((2 * c, c, 3, 3, 3))}               # ConvTranspose3d (Cin,Cout,...)

    return {
        'fe': fe,
        'ph1': [g.conv((C, 2 * C, 3, 3, 3)), g.conv((C, C, 3, 3, 3))],
        'ph2': [g.conv((C, C, 3, 3, 3)), g.conv((C, C, 3, 3, 3))],
        'hg1': hourglass_params(C),
        'hg2': hourglass_params(C),
        'hg3': hourglass_params(C),
        'cd1': [g.conv((C, C, 3, 3, 3)), g.conv((1, C, 3, 3, 3))],
        'cd2': [g.conv((C, C, 3, 3, 3)), g.conv((1, C, 3, 3, 3))],
        'cd3': [g.conv((C, C, 3, 3, 3)), g.conv((1, C, 3, 3, 3))],
    }


# ---------------------------------------------------------------------------
# Forward pass
# ---------------------------------------------------------------------------
def layer_block(x, bp, stride, padding, dilation, ft_w):
    out = cb2d(x, bp['c1'], stride, padding, dilation, relu=True)
    shortcut = x if ft_w is None else cb2d(x, ft_w, stride, 0, 1)
    return cb2d(out, bp['c2'], 1, padding, dilation, residual=shortcut)


def fel_forward(x, fp, stride, padding, dilation):
    blocks = fp['blocks']
    x = layer_block(x, blocks[0], stride, padding, dilation, fp.get('ft'))
    for bp in blocks[1:]:
        x = layer_block(x, bp, 1, padding, dilation, None)
    return x


def feature_extraction(x, p):
    out = cb2d(x, p['pre'][0], 2, 1, 1, relu=True)
    out = cb2d(out, p['pre'][1], 1, 1, 1, relu=True)
    out = cb2d(out, p['pre'][2], 1, 1, 1, relu=True)
    out = fel_forward(out, p['fe1'], 1, 1, 1)
    out_raw = fel_forward(out, p['fe2'], 2, 1, 1)
    out = fel_forward(out_raw, p['fe3'], 1, 1, 1)
    out_skip = fel_forward(out, p['fe4'], 1, 1, 2)
    h, w = out_skip.shape[2], out_skip.shape[3]
    # NOTE: the reference forward applies SPP1 four times (original code's bug);
    # the four results are identical, so compute once and reuse.
    spp = avg_pool2d(out_skip, 64)
    spp = cb2d(spp, p['spp1'], 1, 0, 1, relu=True)
    spp = bilinear_resize(spp, (h, w))
    out = jnp.concatenate([out_raw, out_skip, spp, spp, spp, spp], axis=1)
    out = cb2d(out, p['post1'], 1, 1, 1, relu=True)
    out = conv2d(out, p['post2'], stride=1, padding=0, dilation=1)  # last conv: no BN
    return out


def hourglass(x, pre_squ, post_squ, p):
    out = cb3d(x, p['c1'], 2, 1, relu=True)
    pre = cb3d(out, p['c2'], 1, 1, relu=True, residual=post_squ)
    out = cb3d(pre, p['c3'], 2, 1, relu=True)
    out = cb3d(out, p['c4'], 1, 1, relu=True)
    up5 = conv_transpose3d(out, p['c5'], scale=_BN_SCALE)
    post = jnp.maximum(up5 + (pre_squ if pre_squ is not None else pre), 0.0)
    out = conv_transpose3d(post, p['c6'], scale=_BN_SCALE)
    return out, pre, post


def psmnet_forward(L, R, params, max_disp):
    ref_f = feature_extraction(L, params['fe'])
    tgt_f = feature_extraction(R, params['fe'])
    D = max_disp // 4

    cost = build_cost_volume(ref_f, tgt_f, num_disp=D)

    cost0 = cb3d(cost, params['ph1'][0], 1, 1, relu=True)
    cost0 = cb3d(cost0, params['ph1'][1], 1, 1, relu=True)
    t = cb3d(cost0, params['ph2'][0], 1, 1, relu=True)
    cost0 = cb3d(t, params['ph2'][1], 1, 1, residual=cost0)

    out1, pre1, post1 = hourglass(cost0, None, None, params['hg1'])
    out1 = out1 + cost0
    out2, pre2, post2 = hourglass(out1, pre1, post1, params['hg2'])
    out2 = out2 + cost0
    out3, pre3, post3 = hourglass(out2, pre1, post2, params['hg3'])
    out3 = out3 + cost0

    def cd(x, cp, res):
        y = cb3d(x, cp[0], 1, 1, relu=True)
        return conv3d(y, cp[1], res, stride=1, padding=1, dilation=1)  # no BN

    cost1 = cd(out1, params['cd1'], None)
    cost2 = cd(out2, params['cd2'], cost1)
    cost3 = cd(out3, params['cd3'], cost2)

    H, W = L.shape[2], L.shape[3]
    cost3 = trilinear_resize(cost3, (max_disp, H, W))     # (B, 1, maxDisp, H, W)
    cost3 = cost3[:, 0]
    pred3 = softmax_disp_regression(cost3)                # fused Pallas kernel
    return pred3


if __name__ == "__main__":
    root = jax.random.PRNGKey(0)
    k_param, k_l, k_r = jax.random.split(root, 3)

    B, in_channels, H, W = 1, 3, 256, 256   # H=W=256 is the smallest spatial size
    feat_channels, max_disp = 4, 16         # compatible with AvgPool2d(64) at H/4
                                            # and the hourglass stride-2 pyramid.

    params = make_psmnet_params(k_param, in_channels, feat_channels)
    L = jax.random.normal(k_l, (B, in_channels, H, W), dtype=jnp.float32)
    R = jax.random.normal(k_r, (B, in_channels, H, W), dtype=jnp.float32)

    pred3 = psmnet_forward(L, R, params, max_disp)
    pred3 = jax.block_until_ready(pred3)

    assert pred3.shape == (B, H, W), pred3.shape
    assert bool(jnp.all(jnp.isfinite(pred3)))
    print("KERNEL_OK")
</pallas_src>

<mosaic_0001>
module attributes {stable_mosaic.version = 11 : i64} {
  func.func @_direct_conv_kernel(%arg0: i32, %arg1: i32, %arg2: memref<1x12x4386xbf16, #tpu.memory_space<vmem>>, %arg3: memref<4x8x12xbf16, #tpu.memory_space<vmem>>, %arg4: memref<1x8x4224xf32, #tpu.memory_space<vmem>>) attributes {dimension_semantics = [#tpu.dimension_semantics<parallel>, #tpu.dimension_semantics<parallel>], iteration_bounds = array<i64: 4, 1>, scalar_prefetch = 0 : i64, scratch_operands = 0 : i64, tpu.core_type = #tpu.core_type<tc>, window_params = [{transform_indices = @transform_0, window_bounds = array<i64: 1, 12, 4386>}, {transform_indices = @transform_1, window_bounds = array<i64: 4, 8, 12>}, {transform_indices = @transform_2, window_bounds = array<i64: 1, 8, 4224>}]} {
    %c0 = arith.constant 0 : index
    %c0_0 = arith.constant 0 : index
    %c0_1 = arith.constant 0 : index
    %0 = vector.load %arg3[%c0, %c0_0, %c0_1] : memref<4x8x12xbf16, #tpu.memory_space<vmem>>, vector<1x8x12xbf16>
    %1 = vector.shape_cast %0 : vector<1x8x12xbf16> to vector<8x12xbf16>
    %c0_2 = arith.constant 0 : index
    %c0_3 = arith.constant 0 : index
    %c0_4 = arith.constant 0 : index
    %2 = vector.load %arg2[%c0_2, %c0_3, %c0_4] : memref<1x12x4386xbf16, #tpu.memory_space<vmem>>, vector<1x12x4224xbf16>
    %3 = vector.shape_cast %2 : vector<1x12x4224xbf16> to vector<12x4224xbf16>
    %cst = arith.constant dense<0.000000e+00> : vector<8x4224xf32>
    %4 = tpu.matmul %1, %3, %cst {dimension_numbers = #tpu.dot_dimension_numbers<[1], [0], [0], [1], [0, 0, 1, 1], [], []>} : vector<8x12xbf16>, vector<12x4224xbf16>, vector<8x4224xf32> -> vector<8x4224xf32>
    %c0_5 = arith.constant 0 : index
    %c0_6 = arith.constant 0 : index
    %c0_7 = arith.constant 0 : index
    %5 = vector.load %arg4[%c0_5, %c0_6, %c0_7] : memref<1x8x4224xf32, #tpu.memory_space<vmem>>, vector<1x8x4224xf32>
    %6 = vector.shape_cast %5 : vector<1x8x4224xf32> to vector<8x4224xf32>
    %7 = vector.shape_cast %4 : vector<8x4224xf32> to vector<1x8x4224xf32>
    tpu.vector_store %arg4[%c0_5, %c0_6, %c0_7], %7 {strides = array<i32>} : memref<1x8x4224xf32, #tpu.memory_space<vmem>>, vector<1x8x4224xf32>,
    %c0_8 = arith.constant 0 : index
    %c0_9 = arith.constant 0 : index
    %c0_10 = arith.constant 0 : index
    %8 = vector.load %arg4[%c0_8, %c0_9, %c0_10] : memref<1x8x4224xf32, #tpu.memory_space<vmem>>, vector<1x8x4224xf32>
    %9 = vector.shape_cast %8 : vector<1x8x4224xf32> to vector<8x4224xf32>
    %c1 = arith.constant 1 : index
    %c0_11 = arith.constant 0 : index
    %c0_12 = arith.constant 0 : index
    %10 = vector.load %arg3[%c1, %c0_11, %c0_12] : memref<4x8x12xbf16, #tpu.memory_space<vmem>>, vector<1x8x12xbf16>
    %11 = vector.shape_cast %10 : vector<1x8x12xbf16> to vector<8x12xbf16>
    %c0_13 = arith.constant 0 : index
    %c0_14 = arith.constant 0 : index
    %c1_15 = arith.constant 1 : index
    %12 = vector.load %arg2[%c0_13, %c0_14, %c1_15] : memref<1x12x4386xbf16, #tpu.memory_space<vmem>>, vector<1x12x4224xbf16>
    %13 = vector.shape_cast %12 : vector<1x12x4224xbf16> to vector<12x4224xbf16>
    %cst_16 = arith.constant dense<0.000000e+00> : vector<8x4224xf32>
    %14 = tpu.matmul %11, %13, %cst_16 {dimension_numbers = #tpu.dot_dimension_numbers<[1], [0], [0], [1], [0, 0, 1, 1], [], []>} : vector<8x12xbf16>, vector<12x4224xbf16>, vector<8x4224xf32> -> vector<8x4224xf32>
    %15 = arith.addf %9, %14 : vector<8x4224xf32>
    %c0_17 = arith.constant 0 : index
    %c0_18 = arith.constant 0 : index
    %c0_19 = arith.constant 0 : index
    %16 = vector.load %arg4[%c0_17, %c0_18, %c0_19] : memref<1x8x4224xf32, #tpu.memory_space<vmem>>, vector<1x8x4224xf32>
    %17 = vector.shape_cast %16 : vector<1x8x4224xf32> to vector<8x4224xf32>
    %18 = vector.shape_cast %15 : vector<8x4224xf32> to vector<1x8x4224xf32>
    tpu.vector_store %arg4[%c0_17, %c0_18, %c0_19], %18 {strides = array<i32>} : memref<1x8x4224xf32, #tpu.memory_space<vmem>>, vector<1x8x4224xf32>,
    %c0_20 = arith.constant 0 : index
    %c0_21 = arith.constant 0 : index
    %c0_22 = arith.constant 0 : index
    %19 = vector.load %arg4[%c0_20, %c0_21, %c0_22] : memref<1x8x4224xf32, #tpu.memory_space<vmem>>, vector<1x8x4224xf32>
    %20 = vector.shape_cast %19 : vector<1x8x4224xf32> to vector<8x4224xf32>
    %c2 = arith.constant 2 : index
    %c0_23 = arith.constant 0 : index
    %c0_24 = arith.constant 0 : index
    %21 = vector.load %arg3[%c2, %c0_23, %c0_24] : memref<4x8x12xbf16, #tpu.memory_space<vmem>>, vector<1x8x12xbf16>
    %22 = vector.shape_cast %21 : vector<1x8x12xbf16> to vector<8x12xbf16>
    %c0_25 = arith.constant 0 : index
    %c0_26 = arith.constant 0 : index
    %c129 = arith.constant 129 : index
    %23 = vector.load %arg2[%c0_25, %c0_26, %c129] : memref<1x12x4386xbf16, #tpu.memory_space<vmem>>, vector<1x12x4224xbf16>
    %24 = vector.shape_cast %23 : vector<1x12x4224xbf16> to vector<12x4224xbf16>
    %cst_27 = arith.constant dense<0.000000e+00> : vector<8x4224xf32>
    %25 = tpu.matmul %22, %24, %cst_27 {dimension_numbers = #tpu.dot_dimension_numbers<[1], [0], [0], [1], [0, 0, 1, 1], [], []>} : vector<8x12xbf16>, vector<12x4224xbf16>, vector<8x4224xf32> -> vector<8x4224xf32>
    %26 = arith.addf %20, %25 : vector<8x4224xf32>
    %c0_28 = arith.constant 0 : index
    %c0_29 = arith.constant 0 : index
    %c0_30 = arith.constant 0 : index
    %27 = vector.load %arg4[%c0_28, %c0_29, %c0_30] : memref<1x8x4224xf32, #tpu.memory_space<vmem>>, vector<1x8x4224xf32>
    %28 = vector.shape_cast %27 : vector<1x8x4224xf32> to vector<8x4224xf32>
    %29 = vector.shape_cast %26 : vector<8x4224xf32> to vector<1x8x4224xf32>
    tpu.vector_store %arg4[%c0_28, %c0_29, %c0_30], %29 {strides = array<i32>} : memref<1x8x4224xf32, #tpu.memory_space<vmem>>, vector<1x8x4224xf32>,
    %c0_31 = arith.constant 0 : index
    %c0_32 = arith.constant 0 : index
    %c0_33 = arith.constant 0 : index
    %30 = vector.load %arg4[%c0_31, %c0_32, %c0_33] : memref<1x8x4224xf32, #tpu.memory_space<vmem>>, vector<1x8x4224xf32>
    %31 = vector.shape_cast %30 : vector<1x8x4224xf32> to vector<8x4224xf32>
    %c3 = arith.constant 3 : index
    %c0_34 = arith.constant 0 : index
    %c0_35 = arith.constant 0 : index
    %32 = vector.load %arg3[%c3, %c0_34, %c0_35] : memref<4x8x12xbf16, #tpu.memory_space<vmem>>, vector<1x8x12xbf16>
    %33 = vector.shape_cast %32 : vector<1x8x12xbf16> to vector<8x12xbf16>
    %c0_36 = arith.constant 0 : index
    %c0_37 = arith.constant 0 : index
    %c130 = arith.constant 130 : index
    %34 = vector.load %arg2[%c0_36, %c0_37, %c130] : memref<1x12x4386xbf16, #tpu.memory_space<vmem>>, vector<1x12x4224xbf16>
    %35 = vector.shape_cast %34 : vector<1x12x4224xbf16> to vector<12x4224xbf16>
    %cst_38 = arith.constant dense<0.000000e+00> : vector<8x4224xf32>
    %36 = tpu.matmul %33, %35, %cst_38 {dimension_numbers = #tpu.dot_dimension_numbers<[1], [0], [0], [1], [0, 0, 1, 1], [], []>} : vector<8x12xbf16>, vector<12x4224xbf16>, vector<8x4224xf32> -> vector<8x4224xf32>
    %37 = arith.addf %31, %36 : vector<8x4224xf32>
    %c0_39 = arith.constant 0 : index
    %c0_40 = arith.constant 0 : index
    %c0_41 = arith.constant 0 : index
    %38 = vector.load %arg4[%c0_39, %c0_40, %c0_41] : memref<1x8x4224xf32, #tpu.memory_space<vmem>>, vector<1x8x4224xf32>
    %39 = vector.shape_cast %38 : vector<1x8x4224xf32> to vector<8x4224xf32>
    %40 = vector.shape_cast %37 : vector<8x4224xf32> to vector<1x8x4224xf32>
    tpu.vector_store %arg4[%c0_39, %c0_40, %c0_41], %40 {strides = array<i32>} : memref<1x8x4224xf32, #tpu.memory_space<vmem>>, vector<1x8x4224xf32>,
    %c0_42 = arith.constant 0 : index
    %c0_43 = arith.constant 0 : index
    %c0_44 = arith.constant 0 : index
    %41 = vector.load %arg4[%c0_42, %c0_43, %c0_44] : memref<1x8x4224xf32, #tpu.memory_space<vmem>>, vector<1x8x4224xf32>
    %42 = vector.shape_cast %41 : vector<1x8x4224xf32> to vector<8x4224xf32>
    %cst_45 = arith.constant 0.000000e+00 : f32
    %43 = vector.broadcast %cst_45 : f32 to vector<8x4224xf32>
    %44 = arith.maximumf %42, %43 : vector<8x4224xf32>
    %c0_46 = arith.constant 0 : index
    %c0_47 = arith.constant 0 : index
    %c0_48 = arith.constant 0 : index
    %45 = vector.load %arg4[%c0_46, %c0_47, %c0_48] : memref<1x8x4224xf32, #tpu.memory_space<vmem>>, vector<1x8x4224xf32>
    %46 = vector.shape_cast %45 : vector<1x8x4224xf32> to vector<8x4224xf32>
    %47 = vector.shape_cast %44 : vector<8x4224xf32> to vector<1x8x4224xf32>
    tpu.vector_store %arg4[%c0_46, %c0_47, %c0_48], %47 {strides = array<i32>} : memref<1x8x4224xf32, #tpu.memory_space<vmem>>, vector<1x8x4224xf32>,
    return
  }
  func.func @transform_0(%arg0: i32, %arg1: i32) -> (i32, i32, i32) {
    %c0_i32 = arith.constant 0 : i32
    %c0_i32_0 = arith.constant 0 : i32
    %c0_i32_1 = arith.constant 0 : i32
    return %arg0, %c0_i32, %c0_i32_0 : i32, i32, i32
  }
  func.func @transform_1(%arg0: i32, %arg1: i32) -> (i32, i32, i32) {
    %c0_i32 = arith.constant 0 : i32
    %c0_i32_0 = arith.constant 0 : i32
    %c0_i32_1 = arith.constant 0 : i32
    return %c0_i32, %arg1, %c0_i32_0 : i32, i32, i32
  }
  func.func @transform_2(%arg0: i32, %arg1: i32) -> (i32, i32, i32) {
    %c0_i32 = arith.constant 0 : i32
    %c0_i32_0 = arith.constant 0 : i32
    return %arg0, %arg1, %c0_i32 : i32, i32, i32
  }
}

</mosaic_0001>

<bundles_post_ra>
// kernel: conv2d.1
= control target key start
LH: loop header
LB: loop body
LE: loop exit
PB: predicated region body
PF: predicated region fallthrough
CT: control target
= control target key end

     0   :  { %s5626_s9 = smov 0   ;;  %s5628_s10 = smov 0   ;;  %s6563_s0 = inlined_call_operand.vmem [shape: bf16[4,12,4386], index: 0, kind: input, shape index: {}]   ;;  %s6564_s1 = inlined_call_operand.vmem [shape: bf16[4,8,12], index: 1, kind: input, shape index: {}]   ;;  %s6565_s2 = inlined_call_operand.vmem [shape: f32[4,8,4224], index: 2, kind: output, shape index: {}]  }
   0x1   :  { %s5630_s11 = smov 0  }
   0x2 LB: > { %s24_s12 = sadd.s32 1, %s5600_s10  ;;  %p4900_p0 = scmp.ge.s32.totalorder %s5604_s11, 1  ;;  %s5604_s11 = sphi %s5630_s11, %s12_s11   ;;  %s5600_s10 = sphi %s5628_s10, %s6567_s10   ;;  %s5596_s9 = sphi %s5626_s9, %s6566_s9  }
   0x3   : > { %p26_p1 = scmp.ge.s32.totalorder %s24_s12, 4  ;;  %p135_p2 = scmp.lt.s32.totalorder %s5604_s11, 5 }
   0x5   : > { %s6569_s12 = smov (%p26_p1, %s24_s12), 0  ;;  %p136_p3 = pnand %p4900_p0, %p135_p2 }
   0x6   : > { %p165_p4 = scmp.lt.s32.totalorder (!%p136_p3), %s5596_s9, 3  ;;  %v5606_v0 = vmov (!%p136_p3), 0   ;;  %s5607_s17 = smov (!%p136_p3), 127   ;;  %vm356_vm0 = vcmask (!%p136_p3), 1045504   ;;  %v5699_v29 = vld [vmem:[%s6564_s1] sm:$0xf] (!%p136_p3) }
   0x7   : > { %139 = sbr.rel (%p136_p3) target bundleno = 570 (0x23a), region = 28  ;;  %488 = vmatprep.mubr.bf16.mxu1 (!%p136_p3), %v5606_v0  ;;  %652 = vmatprep.mubr.bf16.mxu0 (!%p136_p3), %v5606_v0  ;;  %vm352_vm1 = vcmask (!%p136_p3), 97280   ;;  %vm5609_vm2 = vmmov (!%p136_p3), 0   ;;  %vm1458_vm3 = vcmask (!%p136_p3), 1039360   ;;  %s5610_s22 = smov (!%p136_p3), 126   ;;  %vm3799_vm4 = vcmask (!%p136_p3), 1031168  }
   0xe   : > { %s6571_s9 = smov (!%p165_p4, %s5596_s9), 3 }
   0xf   : > { %s5415_s13 = smul.u32 280, %s6571_s9 }
  0x10   : > { %s5416_s27 = smul.u32 264, %s6571_s9 }
  0x11   : > { %s5652_s16 = scalar_lea.vmem %s6563_s0, %s5415_s13 }
  0x12   : > { %v5655_v1 = vld [vmem:[%s5652_s16 + $0x8] sm:$0xff]  ;;  %v1238_v2 = vld [vmem:[%s5652_s16 + $0x94] sm:$0x33]  ;;  %v1220_v3 = vld [vmem:[%s5652_s16] sm:$0xff]  ;;  %s6515_s30 = scalar_lea.vmem %s6565_s2, %s5416_s27 }
  0x13   : > { %v4972_v4 = vcombine.low %v5655_v1, %v1238_v2  ;;  %v1237_v5 = vld [vmem:[%s5652_s16 + $0x8c] sm:$0x33]  ;;  %v1239_v7 = vld [vmem:[%s5652_s16 + $0x9c] sm:$0x33]  ;;  %v5672_v12 = vld [vmem:[%s5652_s16 + $0xa4] sm:$0x33]  ;;  %v4973_v33 = vcombine.high %v5655_v1, %v1238_v2 }
  0x14   : > { %v5662_v6 = vld [vmem:[%s5652_s16 + $0x10] sm:$0xff]  ;;  %v4970_v8 = vcombine.low %v1220_v3, %v1237_v5  ;;  %v4971_v10 = vcombine.high %v1220_v3, %v1237_v5  ;;  %v5669_v11 = vld [vmem:[%s5652_s16 + $0x18] sm:$0xff]  ;;  %v1224_v15 = vld [vmem:[%s5652_s16 + $0x20] sm:$0xff] }
  0x15   : > { %1394 = vrot.lane.b32.xlu1 %v4972_v4, %s5607_s17  ;;  %v4974_v9 = vcombine.low %v5662_v6, %v1239_v7  ;;  %v4976_v13 = vcombine.low %v5669_v11, %v5672_v12  ;;  %v4975_v14 = vcombine.high %v5662_v6, %v1239_v7  ;;  %v1241_v16 = vld [vmem:[%s5652_s16 + $0xac] sm:$0x33]  ;;  %v203_v22 = vld [vmem:[%s5652_s16 + $0x94] sm:$0x33]  ;;  %v204_v32 = vld [vmem:[%s5652_s16 + $0x9c] sm:$0x33]  ;;  %v4977_v54 = vcombine.high %v5669_v11, %v5672_v12 }
  0x16   : > { %1390 = vrot.lane.b32.xlu0 %v4970_v8, %s5607_s17  ;;  %v202_v17 = vld [vmem:[%s5652_s16 + $0x8c] sm:$0x33]  ;;  %v4979_v18 = vcombine.high %v1224_v15, %v1241_v16  ;;  %v4978_v21 = vcombine.low %v1224_v15, %v1241_v16  ;;  %v5689_v24 = vld [vmem:[%s5652_s16 + $0xb4] sm:$0x33]  ;;  %v4906_v26 = vcombine.high %v5655_v1, %v203_v22  ;;  %v4905_v27 = vcombine.low %v5655_v1, %v203_v22  ;;  %v208_v37 = vld [vmem:[%s5652_s16 + $0xbc] sm:$0x33] }
  0x17   : > { %v4904_v19 = vcombine.high %v1220_v3, %v202_v17  ;;  %v4903_v20 = vcombine.low %v1220_v3, %v202_v17  ;;  %v5686_v23 = vld [vmem:[%s5652_s16 + $0x28] sm:$0xff]  ;;  %v1226_v34 = vld [vmem:[%s5652_s16 + $0x30] sm:$0xff]  ;;  %v4908_v36 = vcombine.high %v5662_v6, %v204_v32  ;;  %v1243_v39 = vld [vmem:[%s5652_s16 + $0xbc] sm:$0x33]  ;;  %v4907_v46 = vcombine.low %v5662_v6, %v204_v32 }
  0x18   : > { %v206_v28 = vld [vmem:[%s5652_s16 + $0xac] sm:$0x33]  ;;  %v364_v35 = vsel %vm356_vm0, %v4905_v27, 0  ;;  %v4980_v38 = vcombine.low %v5686_v23, %v5689_v24  ;;  %v4915_v41 = vcombine.low %v1226_v34, %v208_v37  ;;  %v4916_v42 = vcombine.high %v1226_v34, %v208_v37  ;;  %v1228_v44 = vld [vmem:[%s5652_s16 + $0x40] sm:$0xff]  ;;  %v5729_v51 = vld [vmem:[%s5652_s16 + $0x38] sm:$0xff] }
  0x19   : > { %1398 = vrot.lane.b32.xlu1 %v4974_v9, %s5607_s17  ;;  %4936 = vmatprep.subr.msk.bf16.mxu1 %vm356_vm0, %v4904_v19  ;;  %v358_v25 = vsel %vm356_vm0, %v4903_v20, 0  ;;  %v4912_v30 = vcombine.high %v1224_v15, %v206_v28  ;;  %v4911_v31 = vcombine.low %v1224_v15, %v206_v28  ;;  %v210_v43 = vld [vmem:[%s5652_s16 + $0xcc] sm:$0x33]  ;;  %v4983_v45 = vcombine.high %v1226_v34, %v1243_v39  ;;  %v205_v50 = vld [vmem:[%s5652_s16 + $0xa4] sm:$0x33]  ;;  %v5790_v20 = vld [vmem:[%s5652_s16 + $0x58] sm:$0xff] }
  0x1a   : > { %1392 = vrot.lane.b32.xlu0 %v4971_v10, %s5607_s17  ;;  %457 = vmatpush1.bf16.msra.mxu1 %v358_v25  ;;  %v394_v47 = vsel %vm356_vm0, %v4915_v41, 0  ;;  %v4920_v48 = vcombine.high %v1228_v44, %v210_v43  ;;  %v4982_v49 = vcombine.low %v1226_v34, %v1243_v39  ;;  %v5732_v52 = vld [vmem:[%s5652_s16 + $0xc4] sm:$0x33]  ;;  %v4919_v53 = vcombine.low %v1228_v44, %v210_v43  ;;  %v212_v57 = vld [vmem:[%s5652_s16 + $0xdc] sm:$0x33]  ;;  %v1230_v60 = vld [vmem:[%s5652_s16 + $0x50] sm:$0xff] }
  0x1b   : > { %4938 = vmatprep.subr.msk.bf16.mxu1 %vm356_vm0, %v4906_v26  ;;  %4944 = vmatprep.subr.msk.bf16.mxu0 %vm356_vm0, %v4912_v30  ;;  %v382_v40 = vsel %vm356_vm0, %v4911_v31, 0  ;;  %v370_v55 = vsel %vm356_vm0, %v4907_v46, 0  ;;  %v4910_v56 = vcombine.high %v5669_v11, %v205_v50  ;;  %v4984_v58 = vcombine.low %v5729_v51, %v5732_v52  ;;  %v1245_v59 = vld [vmem:[%s5652_s16 + $0xcc] sm:$0x33]  ;;  %v207_v3 = vld [vmem:[%s5652_s16 + $0xb4] sm:$0x33] }
  0x1c   : > { %621 = vmatpush1.bf16.msra.mxu0 %v382_v40  ;;  %v406_v61 = vsel %vm356_vm0, %v4919_v53, 0  ;;  %v4924_v62 = vcombine.high %v1230_v60, %v212_v57  ;;  %v4987_v63 = vcombine.high %v1228_v44, %v1245_v59  ;;  %v4909_v1 = vcombine.low %v5669_v11, %v205_v50  ;;  %v5760_v4 = vld [vmem:[%s5652_s16 + $0x48] sm:$0xff]  ;;  %v5763_v5 = vld [vmem:[%s5652_s16 + $0xd4] sm:$0x33]  ;;  %v1247_v12 = vld [vmem:[%s5652_s16 + $0xdc] sm:$0x33] }
  0x1d   : > { %1402 = vrot.lane.b32.xlu1 %v4976_v13, %s5607_s17  ;;  %4937 = vmatmul.mubr.msk.bf16.vlgmr.msra.gmra.mrb[0].mxu1 %vm352_vm1, %v5699_v29  ;;  %v4986_v2 = vcombine.low %v1228_v44, %v1245_v59  ;;  %v4923_v6 = vcombine.low %v1230_v60, %v212_v57  ;;  %v4981_v7 = vcombine.high %v5686_v23, %v5689_v24  ;;  %v214_v10 = vld [vmem:[%s5652_s16 + $0xec] sm:$0x33]  ;;  %v1232_v13 = vld [vmem:[%s5652_s16 + $0x60] sm:$0xff]  ;;  %v5848_v50 = vld [vmem:[%s5652_s16 + $0x78] sm:$0xff] }
  0x1e   : > { %1400 = vrot.lane.b32.xlu0 %v4975_v14, %s5607_s17  ;;  %498 = vmatpush1.bf16.msra.mxu1 %v364_v35  ;;  %v376_v8 = vsel %vm356_vm0, %v4909_v1, 0  ;;  %v4914_v9 = vcombine.high %v5686_v23, %v207_v3  ;;  %v4988_v11 = vcombine.low %v5760_v4, %v5763_v5  ;;  %v4928_v15 = vcombine.high %v1232_v13, %v214_v10  ;;  %v209_v19 = vld [vmem:[%s5652_s16 + $0xc4] sm:$0x33]  ;;  %v216_v26 = vld [vmem:[%s5652_s16 + $0xfc] sm:$0x33]  ;;  %v1234_v30 = vld [vmem:[%s5652_s16 + $0x70] sm:$0xff] }
  0x1f   : > { %529 = vmatprep.mubr.bf16.mxu1 %v5606_v0  ;;  %4940 = vmatprep.subr.msk.bf16.mxu1 %vm356_vm0, %v4908_v36  ;;  %v418_v14 = vsel %vm356_vm0, %v4923_v6, 0  ;;  %v4991_v16 = vcombine.high %v1230_v60, %v1247_v12  ;;  %v4913_v17 = vcombine.low %v5686_v23, %v207_v3  ;;  %v4927_v22 = vcombine.low %v1232_v13, %v214_v10  ;;  %v1249_v28 = vld [vmem:[%s5652_s16 + $0xec] sm:$0x33]  ;;  %v211_v36 = vld [vmem:[%s5652_s16 + $0xd4] sm:$0x33] }
  0x20   : > { %4945 = vmatmul.mubr.msk.bf16.vlgmr.msra.gmra.mrb[0].mxu0 %vm352_vm1, %v5699_v29  ;;  %4948 = vmatprep.subr.msk.bf16.mxu0 %vm356_vm0, %v4916_v42  ;;  %v4985_v23 = vcombine.high %v5729_v51, %v5732_v52  ;;  %v4918_v25 = vcombine.high %v5729_v51, %v209_v19  ;;  %v4932_v32 = vcombine.high %v1234_v30, %v216_v26  ;;  %v5820_v37 = vld [vmem:[%s5652_s16 + $0x68] sm:$0xff]  ;;  %v1251_v44 = vld [vmem:[%s5652_s16 + $0xfc] sm:$0x33]  ;;  %v5608_v52 = vmov 0.0   ;;  %v215_v1 = vld [vmem:[%s5652_s16 + $0xf4] sm:$0x33] }
  0x21   : > { %1408 = vrot.lane.b32.xlu1 %v4979_v18, %s5607_s17  ;;  %734 = vmatprep.mubr.bf16.mxu0 %v5606_v0  ;;  %v4990_v18 = vcombine.low %v1230_v60, %v1247_v12  ;;  %v388_v24 = vsel %vm356_vm0, %v4913_v17, 0  ;;  %v430_v31 = vsel %vm356_vm0, %v4927_v22, 0  ;;  %v4917_v34 = vcombine.low %v5729_v51, %v209_v19  ;;  %v5851_v51 = vld [vmem:[%s5652_s16 + $0x104] sm:$0x33]  ;;  %v5891_v6 = vld [vmem:[%s5652_s16 + $0xc] sm:$0xff] }
  0x22   : > { %1406 = vrot.lane.b32.xlu0 %v4978_v21, %s5607_s17  ;;  %703 = vmatpush1.bf16.msra.mxu0 %v394_v47  ;;  %v5793_v21 = vld [vmem:[%s5652_s16 + $0xe4] sm:$0x33]  ;;  %v4994_v35 = vcombine.low %v1232_v13, %v1249_v28  ;;  %v4931_v39 = vcombine.low %v1234_v30, %v216_v26  ;;  %v4989_v40 = vcombine.high %v5760_v4, %v5763_v5  ;;  %v5533_v53 = vld [vmem:[%s5652_s16 + $0x80] ss:$140 sps:$4 sm:$0x3f]  }
  0x23   : > { %4952 = vmatprep.subr.msk.bf16.mxu0 %vm356_vm0, %v4920_v48  ;;  %v4992_v27 = vcombine.low %v5790_v20, %v5793_v21  ;;  %v400_v41 = vsel %vm356_vm0, %v4917_v34, 0  ;;  %v4922_v42 = vcombine.high %v5760_v4, %v211_v36  ;;  %v4999_v46 = vcombine.high %v1234_v30, %v1251_v44  ;;  %v5478_v59 = vld [vmem:[%s5652_s16 + $0x84] ss:$140 sps:$4 sm:$0x3f]   ;;  %v2411_v19 = vld [vmem:[%s5652_s16 + $0xa8] sm:$0x33] }
  0x24   : > { %v4921_v47 = vcombine.low %v5760_v4, %v211_v36  ;;  %v4998_v48 = vcombine.low %v1234_v30, %v1251_v44  ;;  %v5000_v57 = vcombine.low %v5848_v50, %v5851_v51  ;;  %v5480_v60 = vld [vmem:[%s5652_s16 + $0x80] ss:$140 sps:$4 sm:$0x3f]   ;;  %v4930_v4 = vcombine.high %v5820_v37, %v215_v1  ;;  %v2413_v30 = vld [vmem:[%s5652_s16 + $0xb8] sm:$0x33] }
  0x25   : > { %1396 = vrot.lane.b32.xlu1 %v4973_v33, %s5607_s17  ;;  %4939 = vmatmul.mubr.msk.bf16.vlgmr.msra.gmra.mrb[4].mxu1 %vm352_vm1, %v5699_v29  ;;  %v4995_v33 = vcombine.high %v1232_v13, %v1249_v28  ;;  %v2410_v12 = vld [vmem:[%s5652_s16 + $0xa0] sm:$0x33]  ;;  %v5001_v17 = vcombine.high %v5848_v50, %v5851_v51  ;;  %v5941_v28 = vld [vmem:[%s5652_s16 + $0x2c] sm:$0xff] }
  0x26   : > { %1410 = vrot.lane.b32.xlu0 %v4980_v38, %s5607_s17  ;;  %539 = vmatpush1.bf16.msra.mxu1 %v370_v55  ;;  %v5823_v38 = vld [vmem:[%s5652_s16 + $0xf4] sm:$0x33]  ;;  %v412_v55 = vsel %vm356_vm0, %v4921_v47, 0  ;;  %v217_v13 = vld [vmem:[%s5652_s16 + $0x104] sm:$0x33]  ;;  %v5979_v44 = vld [vmem:[%s5652_s16 + $0x4c] sm:$0xff] }
  0x27   : > { %570 = vmatprep.mubr.bf16.mxu1 %v5606_v0  ;;  %4942 = vmatprep.subr.msk.bf16.mxu1 %vm356_vm0, %v4910_v56  ;;  %v4996_v43 = vcombine.low %v5820_v37, %v5823_v38  ;;  %v4997_v5 = vcombine.high %v5820_v37, %v5823_v38  ;;  %v2414_v34 = vld [vmem:[%s5652_s16 + $0xc0] sm:$0x33]  ;;  %v2415_v38 = vld [vmem:[%s5652_s16 + $0xc8] sm:$0x33] }
  0x28   : > { %4949 = vmatmul.mubr.msk.bf16.vlgmr.msra.gmra.mrb[4].mxu0 %vm352_vm1, %v5699_v29 }
  0x29   : > { %1416 = vrot.lane.b32.xlu1 %v4983_v45, %s5607_s17  ;;  %785 = vmatpush1.bf16.msra.mxu0 %v406_v61  ;;  %v442_v45 = vsel %vm356_vm0, %v4931_v39, 0 }
  0x2a   : > { %1414 = vrot.lane.b32.xlu0 %v4982_v49, %s5607_s17  ;;  %816 = vmatprep.mubr.bf16.mxu0 %v5606_v0  ;;  %v213_v49 = vld [vmem:[%s5652_s16 + $0xe4] sm:$0x33] }
  0x2b   : > { %4956 = vmatprep.subr.msk.bf16.mxu0 %vm356_vm0, %v4924_v62  ;;  %v4926_v56 = vcombine.high %v5790_v20, %v213_v49  ;;  %v4925_v61 = vcombine.low %v5790_v20, %v213_v49  ;;  %v5875_v62 = vld [vmem:[%s5652_s16 + $0x4] sm:$0xff] }
  0x2c   : > { %v2418_v49 = vld [vmem:[%s5652_s16 + $0xe0] sm:$0x33] }
  0x2d   : > { %1404 = vrot.lane.b32.xlu1 %v4977_v54, %s5607_s17  ;;  %4941 = vmatmul.mubr.msk.bf16.vlgmr.msra.gmra.mrb[8].mxu1 %vm352_vm1, %v5699_v29  ;;  %v4993_v54 = vcombine.high %v5790_v20, %v5793_v21  ;;  %v424_v3 = vsel %vm356_vm0, %v4925_v61, 0  ;;  %v4933_v21 = vcombine.low %v5848_v50, %v217_v13  ;;  %v6011_v61 = vld [vmem:[%s5652_s16 + $0x6c] sm:$0xff] }
  0x2e   : > { %1418 = vrot.lane.b32.xlu0 %v4984_v58, %s5607_s17  ;;  %580 = vmatpush1.bf16.msra.mxu1 %v376_v8  ;;  %v454_v58 = vsel %vm356_vm0, %v5533_v53, 0  ;;  %v5995_v53 = vld [vmem:[%s5652_s16 + $0x5c] sm:$0xff] }
  0x2f   : > { %611 = vmatprep.mubr.bf16.mxu1 %v5606_v0  ;;  %4946 = vmatprep.subr.msk.bf16.mxu1 %vm356_vm0, %v4914_v9  ;;  %v4929_v9 = vcombine.low %v5820_v37, %v215_v1  ;;  %v448_v26 = vsel %vm356_vm0, %v4933_v21, 0  ;;  %v5960_v37 = vld [vmem:[%s5652_s16 + $0x3c] sm:$0xff]  ;;  %v6039_v21 = vld [vmem:[%s5652_s16 + $0x84] sm:$0xff] }
  0x30   : > { %4953 = vmatmul.mubr.msk.bf16.vlgmr.msra.gmra.mrb[8].mxu0 %vm352_vm1, %v5699_v29  ;;  %v5052_v39 = vcombine.low %v5960_v37, %v2415_v38  ;;  %v5053_v51 = vcombine.high %v5960_v37, %v2415_v38 }
  0x31   : > { %1424 = vrot.lane.b32.xlu1 %v4987_v63, %s5607_s17  ;;  %867 = vmatpush1.bf16.msra.mxu0 %v418_v14  ;;  %v2408_v63 = vld [vmem:[%s5652_s16 + $0x90] sm:$0x33] }
  0x32   : > { %1422 = vrot.lane.b32.xlu0 %v4986_v2, %s5607_s17  ;;  %898 = vmatprep.mubr.bf16.mxu0 %v5606_v0  ;;  %v5038_v2 = vcombine.low %v5875_v62, %v2408_v63  ;;  %v5039_v10 = vcombine.high %v5875_v62, %v2408_v63  ;;  %v2421_v63 = vld [vmem:[%s5652_s16 + $0xf8] sm:$0x33] }
  0x33   : > { %4960 = vmatprep.subr.msk.bf16.mxu0 %vm356_vm0, %v4928_v15  ;;  %v436_v15 = vsel %vm356_vm0, %v4929_v9, 0  ;;  %v5064_v1 = vcombine.low %v6011_v61, %v2421_v63 }
  0x35   : > { %1412 = vrot.lane.b32.xlu1 %v4981_v7, %s5607_s17  ;;  %4943 = vmatmul.mubr.msk.bf16.vlgmr.msra.gmra.mrb[12].mxu1 %vm352_vm1, %v5699_v29  ;;  %v2409_v7 = vld [vmem:[%s5652_s16 + $0x98] sm:$0x33] }
  0x36   : > { %1426 = vrot.lane.b32.xlu0 %v4988_v11, %s5607_s17  ;;  %662 = vmatpush1.bf16.msra.mxu1 %v388_v24  ;;  %v5040_v8 = vcombine.low %v5891_v6, %v2409_v7  ;;  %v5904_v11 = vld [vmem:[%s5652_s16 + $0x14] sm:$0xff] }
  0x37   : > { %693 = vmatprep.mubr.bf16.mxu1 %v5606_v0  ;;  %4950 = vmatprep.subr.msk.bf16.mxu1 %vm356_vm0, %v4918_v25  ;;  %v5042_v14 = vcombine.low %v5904_v11, %v2410_v12  ;;  %v5043_v22 = vcombine.high %v5904_v11, %v2410_v12  ;;  %v2412_v24 = vld [vmem:[%s5652_s16 + $0xb0] sm:$0x33]  ;;  %v2423_v12 = vld [vmem:[%s5652_s16 + $0x108] sm:$0x33] }
  0x38   : > { %4957 = vmatmul.mubr.msk.bf16.vlgmr.msra.gmra.mrb[12].mxu0 %vm352_vm1, %v5699_v29 }
  0x39   : > { %1432 = vrot.lane.b32.xlu1 %v4991_v16, %s5607_s17  ;;  %949 = vmatpush1.bf16.msra.mxu0 %v430_v31  ;;  %v4934_v16 = vcombine.high %v5848_v50, %v217_v13  ;;  %v5048_v31 = vcombine.low %v5941_v28, %v2413_v30 }
  0x3a   : > { %1430 = vrot.lane.b32.xlu0 %v4990_v18, %s5607_s17  ;;  %980 = vmatprep.mubr.bf16.mxu0 %v5606_v0  ;;  %v5919_v18 = vld [vmem:[%s5652_s16 + $0x1c] sm:$0xff] }
  0x3b   : > { %4964 = vmatprep.subr.msk.bf16.mxu0 %vm356_vm0, %v4932_v32  ;;  %v5044_v20 = vcombine.low %v5919_v18, %v2411_v19  ;;  %v5045_v36 = vcombine.high %v5919_v18, %v2411_v19 }
  0x3d   : > { %1420 = vrot.lane.b32.xlu1 %v4985_v23, %s5607_s17  ;;  %4947 = vmatmul.mubr.msk.bf16.vlgmr.msra.gmra.mrb[16].mxu1 %vm352_vm1, %v5699_v29  ;;  %v5932_v23 = vld [vmem:[%s5652_s16 + $0x24] sm:$0xff] }
  0x3e   : > { %1434 = vrot.lane.b32.xlu0 %v4992_v27, %s5607_s17  ;;  %744 = vmatpush1.bf16.msra.mxu1 %v400_v41  ;;  %v5046_v25 = vcombine.low %v5932_v23, %v2412_v24  ;;  %v5041_v27 = vcombine.high %v5891_v6, %v2409_v7  ;;  %v5047_v32 = vcombine.high %v5932_v23, %v2412_v24  ;;  %v5971_v41 = vld [vmem:[%s5652_s16 + $0x44] sm:$0xff] }
  0x3f   : > { %775 = vmatprep.mubr.bf16.mxu1 %v5606_v0  ;;  %4954 = vmatprep.subr.msk.bf16.mxu1 %vm356_vm0, %v4922_v42  ;;  %v2416_v42 = vld [vmem:[%s5652_s16 + $0xd0] sm:$0x33] }
  0x40   : > { %4961 = vmatmul.mubr.msk.bf16.vlgmr.msra.gmra.mrb[16].mxu0 %vm352_vm1, %v5699_v29  ;;  %v5055_v47 = vcombine.high %v5971_v41, %v2416_v42 }
  0x41   : > { %1440 = vrot.lane.b32.xlu1 %v4995_v33, %s5607_s17  ;;  %1031 = vmatpush1.bf16.msra.mxu0 %v442_v45  ;;  %v5952_v33 = vld [vmem:[%s5652_s16 + $0x34] sm:$0xff] }
  0x42   : > { %1438 = vrot.lane.b32.xlu0 %v4994_v35, %s5607_s17  ;;  %1062 = vmatprep.mubr.bf16.mxu0 %v5606_v0  ;;  %v5050_v35 = vcombine.low %v5952_v33, %v2414_v34  ;;  %v2417_v45 = vld [vmem:[%s5652_s16 + $0xd8] sm:$0x33] }
  0x43   : > { %5183 = vmatprep.subr.bf16.mxu0 %v5608_v52 }
  0x45   : > { %1428 = vrot.lane.b32.xlu1 %v4989_v40, %s5607_s17  ;;  %4951 = vmatmul.mubr.msk.bf16.vlgmr.msra.gmra.mrb[20].mxu1 %vm352_vm1, %v5699_v29  ;;  %v5051_v40 = vcombine.high %v5952_v33, %v2414_v34  ;;  %v5065_v34 = vcombine.high %v6011_v61, %v2421_v63 }
  0x46   : > { %1442 = vrot.lane.b32.xlu0 %v4996_v43, %s5607_s17  ;;  %826 = vmatpush1.bf16.msra.mxu1 %v412_v55  ;;  %v5049_v43 = vcombine.high %v5941_v28, %v2413_v30 }
  0x47   : > { %857 = vmatprep.mubr.bf16.mxu1 %v5606_v0  ;;  %4958 = vmatprep.subr.msk.bf16.mxu1 %vm356_vm0, %v4926_v56 }
  0x48   : > { %4965 = vmatmul.mubr.msk.bf16.vlgmr.msra.gmra.mrb[20].mxu0 %vm352_vm1, %v5699_v29 }
  0x49   : > { %1448 = vrot.lane.b32.xlu1 %v4999_v46, %s5607_s17  ;;  %5184 = vmatpush3.bf16.msra.mxu0 %v454_v58  ;;  %v5056_v46 = vcombine.low %v5979_v44, %v2417_v45  ;;  %v2420_v58 = vld [vmem:[%s5652_s16 + $0xf0] sm:$0x33] }
  0x4a   : > { %1446 = vrot.lane.b32.xlu0 %v4998_v48, %s5607_s17  ;;  %5185 = vmatprep.mubr.msk.bf16.mxu0 %vm5609_vm2, %v5608_v52  ;;  %v5987_v48 = vld [vmem:[%s5652_s16 + $0x54] sm:$0xff] }
  0x4b   : > { %v5058_v50 = vcombine.low %v5987_v48, %v2418_v49  ;;  %v5059_v56 = vcombine.high %v5987_v48, %v2418_v49 }
  0x4d   : > { %1436 = vrot.lane.b32.xlu1 %v4993_v54, %s5607_s17  ;;  %4955 = vmatmul.mubr.msk.bf16.vlgmr.msra.gmra.mrb[24].mxu1 %vm352_vm1, %v5699_v29  ;;  %v2419_v54 = vld [vmem:[%s5652_s16 + $0xe8] sm:$0x33] }
  0x4e   : > { %1450 = vrot.lane.b32.xlu0 %v5000_v57, %s5607_s17  ;;  %908 = vmatpush1.bf16.msra.mxu1 %v424_v3  ;;  %v5060_v55 = vcombine.low %v5995_v53, %v2419_v54  ;;  %v6003_v57 = vld [vmem:[%s5652_s16 + $0x64] sm:$0xff]  ;;  %v6019_v3 = vld [vmem:[%s5652_s16 + $0x74] sm:$0xff]  ;;  %v5061_v9 = vcombine.high %v5995_v53, %v2419_v54 }
  0x4f   : > { %939 = vmatprep.mubr.bf16.mxu1 %v5606_v0  ;;  %4962 = vmatprep.subr.msk.bf16.mxu1 %vm356_vm0, %v4930_v4  ;;  %v2422_v4 = vld [vmem:[%s5652_s16 + $0x100] sm:$0x33] }
  0x50   : > { %5186 = vmatmul.mubr.msk.bf16.vlgmr.msra.gmra.mrb[24].mxu0 %vm352_vm1, %v5699_v29 }
  0x51   : > { %1456 = vrot.lane.b32.xlu1 %v5478_v59, %s5607_s17  ;;  %1626 = vmatprep.mubr.bf16.mxu0 %v5606_v0  ;;  %v5062_v59 = vcombine.low %v6003_v57, %v2420_v58 }
  0x52   : > { %1454 = vrot.lane.b32.xlu0 %v5480_v60, %s5607_s17  ;;  %v5057_v60 = vcombine.high %v5979_v44, %v2417_v45 }
  0x55   : > { %2561 = vrot.lane.b32.xlu1 %v5038_v2, %s5607_s17  ;;  %4959 = vmatmul.mubr.msk.bf16.vlgmr.msra.gmra.mrb[28].mxu1 %vm352_vm1, %v5699_v29  ;;  %v5063_v2 = vcombine.high %v6003_v57, %v2420_v58 }
  0x56   : > { %1444 = vrot.lane.b32.xlu0 %v4997_v5, %s5607_s17  ;;  %990 = vmatpush1.bf16.msra.mxu1 %v436_v15 }
  0x57   : > { %1021 = vmatprep.mubr.bf16.mxu1 %v5606_v0  ;;  %4966 = vmatprep.subr.msk.bf16.mxu1 %vm356_vm0, %v4934_v16 }
  0x59   : > { %2565 = vrot.lane.b32.xlu1 %v5040_v8, %s5607_s17  ;;  %v5066_v8 = vcombine.low %v6019_v3, %v2422_v4 }
  0x5a   : > { %2563 = vrot.lane.b32.xlu0 %v5039_v10, %s5607_s17  ;;  %v6027_v10 = vld [vmem:[%s5652_s16 + $0x7c] sm:$0xff] }
  0x5b   : > { %v5069_v38 = vcombine.high %v6027_v10, %v2423_v12 }
  0x5d   : > { %2569 = vrot.lane.b32.xlu1 %v5042_v14, %s5607_s17  ;;  %4963 = vmatmul.mubr.msk.bf16.vlgmr.msra.gmra.mrb[32].mxu1 %vm352_vm1, %v5699_v29 }
  0x5e   : > { %1452 = vrot.lane.b32.xlu0 %v5001_v17, %s5607_s17  ;;  %1072 = vmatpush1.bf16.msra.mxu1 %v448_v26  ;;  %v5068_v17 = vcombine.low %v6027_v10, %v2423_v12 }
  0x5f   : > { %1103 = vmatprep.mubr.bf16.mxu1 %v5606_v0 }
  0x61   : > { %2573 = vrot.lane.b32.xlu1 %v5044_v20, %s5607_s17  ;;  %v5067_v20 = vcombine.high %v6019_v3, %v2422_v4 }
  0x62   : > { %2571 = vrot.lane.b32.xlu0 %v5043_v22, %s5607_s17  ;;  %v2424_v22 = vld [vmem:[%s5652_s16 + $0x110] sm:$0x33] }
  0x65   : > { %2577 = vrot.lane.b32.xlu1 %v5046_v25, %s5607_s17  ;;  %4967 = vmatmul.mubr.msk.bf16.vlgmr.msra.gmra.mrb[36].mxu1 %vm352_vm1, %v5699_v29  ;;  %v5054_v29 = vcombine.low %v5971_v41, %v2416_v42  ;;  %v6045_v25 = vld [vmem:[%s6564_s1 + $0x4] sm:$0xf] }
  0x66   : > { %2567 = vrot.lane.b32.xlu0 %v5041_v27, %s5607_s17  ;;  %1667 = vmatprep.mubr.bf16.mxu1 %v5606_v0 }
  0x69   : > { %2581 = vrot.lane.b32.xlu1 %v5048_v31, %s5607_s17  ;;  %v5070_v31 = vcombine.low %v6039_v21, %v2424_v22 }
  0x6a   : > { %2579 = vrot.lane.b32.xlu0 %v5047_v32, %s5607_s17 }
  0x6d   : > { %2585 = vrot.lane.b32.xlu1 %v5050_v35, %s5607_s17 }
  0x6e   : > { %2575 = vrot.lane.b32.xlu0 %v5045_v36, %s5607_s17 }
  0x71   : > { %2589 = vrot.lane.b32.xlu1 %v5052_v39, %s5607_s17 }
  0x72   : > { %2587 = vrot.lane.b32.xlu0 %v5051_v40, %s5607_s17  ;;  %v5071_v40 = vcombine.high %v6039_v21, %v2424_v22 }
  0x75   : > { %2593 = vrot.lane.b32.xlu1 %v5054_v29, %s5607_s17  ;;  %v3578_v29 = vld [vmem:[%s5652_s16 + $0x90] sm:$0x33] }
  0x76   : > { %2583 = vrot.lane.b32.xlu0 %v5049_v43, %s5607_s17  ;;  %v5106_v54 = vcombine.low %v5875_v62, %v3578_v29 }
  0x79   : > { %2597 = vrot.lane.b32.xlu1 %v5056_v46, %s5607_s17 }
  0x7a   : > { %2595 = vrot.lane.b32.xlu0 %v5055_v47, %s5607_s17 }
  0x7d   : > { %2601 = vrot.lane.b32.xlu1 %v5058_v50, %s5607_s17 }
  0x7e   : > { %2591 = vrot.lane.b32.xlu0 %v5053_v51, %s5607_s17  ;;  %v5107_v51 = vcombine.high %v5875_v62, %v3578_v29 }
  0x81   : > { %2605 = vrot.lane.b32.xlu1 %v5060_v55, %s5607_s17 }
  0x82   : > { %2603 = vrot.lane.b32.xlu0 %v5059_v56, %s5607_s17  ;;  %v3579_v56 = vld [vmem:[%s5652_s16 + $0x98] sm:$0x33] }
  0x83   : > { %v5108_v62 = vcombine.low %v5891_v6, %v3579_v56 }
  0x85   : > { %2609 = vrot.lane.b32.xlu1 %v5062_v59, %s5607_s17  ;;  %v5109_v59 = vcombine.high %v5891_v6, %v3579_v56 }
  0x86   : > { %2599 = vrot.lane.b32.xlu0 %v5057_v60, %s5607_s17 }
  0x87   : > { %v1395_v5 = vpop.permute.xlu1 %1394 }
  0x88   : > { %v1391_v7 = vpop.permute.xlu0 %1390 }
  0x89   : > { %2613 = vrot.lane.b32.xlu1 %v5064_v1, %s5607_s17  ;;  %v3580_v1 = vld [vmem:[%s5652_s16 + $0xa0] sm:$0x33] }
  0x8a   : > { %2611 = vrot.lane.b32.xlu0 %v5063_v2, %s5607_s17  ;;  %v5111_v6 = vcombine.high %v5904_v11, %v3580_v1  ;;  %v5110_v12 = vcombine.low %v5904_v11, %v3580_v1 }
  0x8b   : > { %v1399_v13 = vpop.permute.xlu1 %1398 }
  0x8c   : > { %v1393_v14 = vpop.permute.xlu0 %1392 }
  0x8d   : > { %v1459_v15 = vsel %vm1458_vm3, %v1391_v7, %v1393_v14  ;;  %2617 = vrot.lane.b32.xlu1 %v5066_v8, %s5607_s17  ;;  %v1460_v16 = vsel %vm1458_vm3, %v1393_v14, %v1395_v5  ;;  %v3581_v14 = vld [vmem:[%s5652_s16 + $0xa8] sm:$0x33] }
  0x8e   : > { %2607 = vrot.lane.b32.xlu0 %v5061_v9, %s5607_s17  ;;  %5004 = vmatprep.subr.msk.bf16.mxu0 %vm356_vm0, %v1460_v16  ;;  %v1496_v19 = vsel %vm356_vm0, %v1459_v15, 0  ;;  %v5113_v16 = vcombine.high %v5919_v18, %v3581_v14  ;;  %v5112_v11 = vcombine.low %v5919_v18, %v3581_v14 }
  0x8f   : > { %1595 = vmatpush1.bf16.msra.mxu0 %v1496_v19  ;;  %v1403_v24 = vpop.permute.xlu1 %1402 }
  0x90   : > { %v1401_v26 = vpop.permute.xlu0 %1400 }
  0x91   : > { %v1463_v27 = vsel %vm1458_vm3, %v1399_v13, %v1401_v26  ;;  %v1464_v30 = vsel %vm1458_vm3, %v1401_v26, %v1403_v24  ;;  %2621 = vrot.lane.b32.xlu1 %v5068_v17, %s5607_s17 }
  0x92   : > { %v1508_v32 = vsel %vm356_vm0, %v1463_v27, 0  ;;  %2619 = vrot.lane.b32.xlu0 %v5067_v20, %s5607_s17  ;;  %5005 = vmatmul.mubr.msk.bf16.vlgmr.msra.gmra.mrb[28].mxu0 %vm352_vm1, %v6045_v25  ;;  %v3582_v20 = vld [vmem:[%s5652_s16 + $0xb0] sm:$0x33] }
  0x93   : > { %5008 = vmatprep.subr.msk.bf16.mxu0 %vm356_vm0, %v1464_v30  ;;  %v1409_v35 = vpop.permute.xlu1 %1408  ;;  %1708 = vmatprep.mubr.bf16.mxu0 %v5606_v0  ;;  %v5115_v18 = vcombine.high %v5932_v23, %v3582_v20 }
  0x94   : > { %1677 = vmatpush1.bf16.msra.mxu0 %v1508_v32  ;;  %v1407_v36 = vpop.permute.xlu0 %1406  ;;  %v5114_v32 = vcombine.low %v5932_v23, %v3582_v20 }
  0x95   : > { %2625 = vrot.lane.b32.xlu1 %v5070_v31, %s5607_s17  ;;  %v1467_v39 = vsel %vm1458_vm3, %v1407_v36, %v1409_v35 }
  0x96   : > { %2615 = vrot.lane.b32.xlu0 %v5065_v34, %s5607_s17  ;;  %v1520_v47 = vsel %vm356_vm0, %v1467_v39, 0 }
  0x97   : > { %v1397_v42 = vpop.permute.xlu1 %1396 }
  0x98   : > { %v1461_v43 = vsel %vm1458_vm3, %v1395_v5, %v1397_v42  ;;  %v1462_v45 = vsel %vm1458_vm3, %v1397_v42, %v1399_v13  ;;  %v1411_v46 = vpop.permute.xlu0 %1410  ;;  %v3584_v42 = vld [vmem:[%s5652_s16 + $0xc0] sm:$0x33] }
  0x99   : > { %v1502_v49 = vsel %vm356_vm0, %v1461_v43, 0  ;;  %v1468_v50 = vsel %vm1458_vm3, %v1409_v35, %v1411_v46  ;;  %2623 = vrot.lane.b32.xlu1 %v5069_v38, %s5607_s17  ;;  %5006 = vmatprep.subr.msk.bf16.mxu1 %vm356_vm0, %v1462_v45  ;;  %v3583_v35 = vld [vmem:[%s5652_s16 + $0xb8] sm:$0x33] }
  0x9a   : > { %2627 = vrot.lane.b32.xlu0 %v5071_v40, %s5607_s17  ;;  %5009 = vmatmul.mubr.msk.bf16.vlgmr.msra.gmra.mrb[32].mxu0 %vm352_vm1, %v6045_v25  ;;  %v5117_v38 = vcombine.high %v5941_v28, %v3583_v35  ;;  %v5116_v23 = vcombine.low %v5941_v28, %v3583_v35  ;;  %v5119_v28 = vcombine.high %v5952_v33, %v3584_v42 }
  0x9b   : > { %5012 = vmatprep.subr.msk.bf16.mxu0 %vm356_vm0, %v1468_v50  ;;  %1636 = vmatpush1.bf16.msra.mxu1 %v1502_v49  ;;  %v1417_v55 = vpop.permute.xlu1 %1416  ;;  %v5118_v50 = vcombine.low %v5952_v33, %v3584_v42 }
  0x9c   : > { %1759 = vmatpush1.bf16.msra.mxu0 %v1520_v47  ;;  %v1415_v58 = vpop.permute.xlu0 %1414  ;;  %1790 = vmatprep.mubr.bf16.mxu0 %v5606_v0 }
  0x9d   : > { %3733 = vrot.lane.b32.xlu1 %v5107_v51, %s5610_s22  ;;  %v1471_v60 = vsel %vm1458_vm3, %v1415_v58, %v1417_v55 }
  0x9e   : > { %3731 = vrot.lane.b32.xlu0 %v5106_v54, %s5610_s22  ;;  %5007 = vmatmul.mubr.msk.bf16.vlgmr.msra.gmra.mrb[4].mxu1 %vm352_vm1, %v6045_v25  ;;  %v1532_v7 = vsel %vm356_vm0, %v1471_v60, 0  ;;  %v3585_v54 = vld [vmem:[%s5652_s16 + $0xc8] sm:$0x33]  ;;  %v3586_v60 = vld [vmem:[%s5652_s16 + $0xd0] sm:$0x33] }
  0x9f   : > { %v1405_v63 = vpop.permute.xlu1 %1404  ;;  %1749 = vmatprep.mubr.bf16.mxu1 %v5606_v0  ;;  %v5121_v56 = vcombine.high %v5960_v37, %v3585_v54  ;;  %v5120_v33 = vcombine.low %v5960_v37, %v3585_v54  ;;  %v5123_v37 = vcombine.high %v5971_v41, %v3586_v60 }
  0xa0   : > { %v1465_v2 = vsel %vm1458_vm3, %v1403_v24, %v1405_v63  ;;  %v1466_v4 = vsel %vm1458_vm3, %v1405_v63, %v1407_v36  ;;  %v1419_v5 = vpop.permute.xlu0 %1418 }
  0xa1   : > { %v1514_v8 = vsel %vm356_vm0, %v1465_v2, 0  ;;  %v1472_v9 = vsel %vm1458_vm3, %v1417_v55, %v1419_v5  ;;  %5010 = vmatprep.subr.msk.bf16.mxu1 %vm356_vm0, %v1466_v4  ;;  %3737 = vrot.lane.b32.xlu1 %v5109_v59, %s5610_s22 }
  0xa2   : > { %3735 = vrot.lane.b32.xlu0 %v5108_v62, %s5610_s22  ;;  %5013 = vmatmul.mubr.msk.bf16.vlgmr.msra.gmra.mrb[0].mxu0 %vm352_vm1, %v6045_v25 }
  0xa3   : > { %5016 = vmatprep.subr.msk.bf16.mxu0 %vm356_vm0, %v1472_v9  ;;  %1718 = vmatpush1.bf16.msra.mxu1 %v1514_v8  ;;  %v1425_v13 = vpop.permute.xlu1 %1424  ;;  %v3587_v9 = vld [vmem:[%s5652_s16 + $0xd8] sm:$0x33] }
  0xa4   : > { %1841 = vmatpush1.bf16.msra.mxu0 %v1532_v7  ;;  %v1423_v15 = vpop.permute.xlu0 %1422  ;;  %1872 = vmatprep.mubr.bf16.mxu0 %v5606_v0  ;;  %v5122_v7 = vcombine.low %v5971_v41, %v3586_v60  ;;  %v5124_v41 = vcombine.low %v5979_v44, %v3587_v9 }
  0xa5   : > { %3741 = vrot.lane.b32.xlu1 %v5111_v6, %s5610_s22  ;;  %v1475_v17 = vsel %vm1458_vm3, %v1423_v15, %v1425_v13 }
  0xa6   : > { %3739 = vrot.lane.b32.xlu0 %v5110_v12, %s5610_s22  ;;  %5011 = vmatmul.mubr.msk.bf16.vlgmr.msra.gmra.mrb[12].mxu1 %vm352_vm1, %v6045_v25  ;;  %v1544_v27 = vsel %vm356_vm0, %v1475_v17, 0  ;;  %v5125_v12 = vcombine.high %v5979_v44, %v3587_v9 }
  0xa7   : > { %v1413_v19 = vpop.permute.xlu1 %1412  ;;  %1831 = vmatprep.mubr.bf16.mxu1 %v5606_v0 }
  0xa8   : > { %v1469_v22 = vsel %vm1458_vm3, %v1411_v46, %v1413_v19  ;;  %v1470_v24 = vsel %vm1458_vm3, %v1413_v19, %v1415_v58  ;;  %v1427_v26 = vpop.permute.xlu0 %1426 }
  0xa9   : > { %v1526_v30 = vsel %vm356_vm0, %v1469_v22, 0  ;;  %v1476_v31 = vsel %vm1458_vm3, %v1425_v13, %v1427_v26  ;;  %5014 = vmatprep.subr.msk.bf16.mxu1 %vm356_vm0, %v1470_v24  ;;  %3745 = vrot.lane.b32.xlu1 %v5113_v16, %s5610_s22 }
  0xaa   : > { %3743 = vrot.lane.b32.xlu0 %v5112_v11, %s5610_s22  ;;  %5017 = vmatmul.mubr.msk.bf16.vlgmr.msra.gmra.mrb[4].mxu0 %vm352_vm1, %v6045_v25 }
  0xab   : > { %5020 = vmatprep.subr.msk.bf16.mxu0 %vm356_vm0, %v1476_v31  ;;  %1800 = vmatpush1.bf16.msra.mxu1 %v1526_v30  ;;  %v1433_v34 = vpop.permute.xlu1 %1432 }
  0xac   : > { %1923 = vmatpush1.bf16.msra.mxu0 %v1544_v27  ;;  %v1431_v36 = vpop.permute.xlu0 %1430  ;;  %1954 = vmatprep.mubr.bf16.mxu0 %v5606_v0  ;;  %v3589_v27 = vld [vmem:[%s5652_s16 + $0xe8] sm:$0x33] }
  0xad   : > { %3749 = vrot.lane.b32.xlu1 %v5115_v18, %s5610_s22  ;;  %v1479_v39 = vsel %vm1458_vm3, %v1431_v36, %v1433_v34  ;;  %v5129_v31 = vcombine.high %v5995_v53, %v3589_v27 }
  0xae   : > { %3747 = vrot.lane.b32.xlu0 %v5114_v32, %s5610_s22  ;;  %5015 = vmatmul.mubr.msk.bf16.vlgmr.msra.gmra.mrb[16].mxu1 %vm352_vm1, %v6045_v25  ;;  %v1556_v46 = vsel %vm356_vm0, %v1479_v39, 0 }
  0xaf   : > { %v1421_v40 = vpop.permute.xlu1 %1420  ;;  %1913 = vmatprep.mubr.bf16.mxu1 %v5606_v0 }
  0xb0   : > { %v1473_v29 = vsel %vm1458_vm3, %v1419_v5, %v1421_v40  ;;  %v1474_v43 = vsel %vm1458_vm3, %v1421_v40, %v1423_v15  ;;  %v1435_v45 = vpop.permute.xlu0 %1434  ;;  %v3588_v15 = vld [vmem:[%s5652_s16 + $0xe0] sm:$0x33] }
  0xb1   : > { %v1538_v47 = vsel %vm356_vm0, %v1473_v29, 0  ;;  %v1480_v49 = vsel %vm1458_vm3, %v1433_v34, %v1435_v45  ;;  %5018 = vmatprep.subr.msk.bf16.mxu1 %vm356_vm0, %v1474_v43  ;;  %3753 = vrot.lane.b32.xlu1 %v5117_v38, %s5610_s22  ;;  %v5127_v44 = vcombine.high %v5987_v48, %v3588_v15  ;;  %v5126_v24 = vcombine.low %v5987_v48, %v3588_v15  ;;  %v3590_v34 = vld [vmem:[%s5652_s16 + $0xf0] sm:$0x33]  ;;  %v3591_v29 = vld [vmem:[%s5652_s16 + $0xf8] sm:$0x33] }
  0xb2   : > { %3751 = vrot.lane.b32.xlu0 %v5116_v23, %s5610_s22  ;;  %5021 = vmatmul.mubr.msk.bf16.vlgmr.msra.gmra.mrb[8].mxu0 %vm352_vm1, %v6045_v25  ;;  %v5128_v48 = vcombine.low %v5995_v53, %v3589_v27  ;;  %v5131_v23 = vcombine.high %v6003_v57, %v3590_v34  ;;  %v5130_v53 = vcombine.low %v6003_v57, %v3590_v34 }
  0xb3   : > { %5024 = vmatprep.subr.msk.bf16.mxu0 %vm356_vm0, %v1480_v49  ;;  %1882 = vmatpush1.bf16.msra.mxu1 %v1538_v47  ;;  %v1441_v51 = vpop.permute.xlu1 %1440  ;;  %v5132_v47 = vcombine.low %v6011_v61, %v3591_v29 }
  0xb4   : > { %2005 = vmatpush1.bf16.msra.mxu0 %v1556_v46  ;;  %v1439_v55 = vpop.permute.xlu0 %1438  ;;  %2036 = vmatprep.mubr.bf16.mxu0 %v5606_v0  ;;  %v5133_v46 = vcombine.high %v6011_v61, %v3591_v29 }
  0xb5   : > { %3757 = vrot.lane.b32.xlu1 %v5119_v28, %s5610_s22  ;;  %v1483_v58 = vsel %vm1458_vm3, %v1439_v55, %v1441_v51  ;;  %v3592_v28 = vld [vmem:[%s5652_s16 + $0x100] sm:$0x33] }
  0xb6   : > { %3755 = vrot.lane.b32.xlu0 %v5118_v50, %s5610_s22  ;;  %5019 = vmatmul.mubr.msk.bf16.vlgmr.msra.gmra.mrb[20].mxu1 %vm352_vm1, %v6045_v25  ;;  %v1568_v2 = vsel %vm356_vm0, %v1483_v58, 0  ;;  %v5134_v58 = vcombine.low %v6019_v3, %v3592_v28 }
  0xb7   : > { %v1429_v59 = vpop.permute.xlu1 %1428  ;;  %1995 = vmatprep.mubr.bf16.mxu1 %v5606_v0 }
  0xb8   : > { %v1477_v62 = vsel %vm1458_vm3, %v1427_v26, %v1429_v59  ;;  %v1478_v63 = vsel %vm1458_vm3, %v1429_v59, %v1431_v36  ;;  %v1443_v1 = vpop.permute.xlu0 %1442  ;;  %v3593_v59 = vld [vmem:[%s5652_s16 + $0x108] sm:$0x33] }
  0xb9   : > { %v1550_v4 = vsel %vm356_vm0, %v1477_v62, 0  ;;  %v1484_v5 = vsel %vm1458_vm3, %v1441_v51, %v1443_v1  ;;  %5022 = vmatprep.subr.msk.bf16.mxu1 %vm356_vm0, %v1478_v63  ;;  %3761 = vrot.lane.b32.xlu1 %v5121_v56, %s5610_s22  ;;  %v5135_v56 = vcombine.high %v6019_v3, %v3592_v28  ;;  %v5137_v63 = vcombine.high %v6027_v10, %v3593_v59 }
  0xba   : > { %3759 = vrot.lane.b32.xlu0 %v5120_v33, %s5610_s22  ;;  %5025 = vmatmul.mubr.msk.bf16.vlgmr.msra.gmra.mrb[12].mxu0 %vm352_vm1, %v6045_v25  ;;  %v5136_v3 = vcombine.low %v6027_v10, %v3593_v59 }
  0xbb   : > { %5028 = vmatprep.subr.msk.bf16.mxu0 %vm356_vm0, %v1484_v5  ;;  %1964 = vmatpush1.bf16.msra.mxu1 %v1550_v4  ;;  %v1449_v8 = vpop.permute.xlu1 %1448  ;;  %v3594_v4 = vld [vmem:[%s5652_s16 + $0x110] sm:$0x33] }
  0xbc   : > { %2087 = vmatpush1.bf16.msra.mxu0 %v1568_v2  ;;  %v1447_v6 = vpop.permute.xlu0 %1446  ;;  %2118 = vmatprep.mubr.bf16.mxu0 %v5606_v0  ;;  %v5139_v10 = vcombine.high %v6039_v21, %v3594_v4 }
  0xbd   : > { %3765 = vrot.lane.b32.xlu1 %v5123_v37, %s5610_s22  ;;  %v1487_v13 = vsel %vm1458_vm3, %v1447_v6, %v1449_v8  ;;  %v6261_v37 = vld [vmem:[%s6564_s1 + $0x8] sm:$0xf] }
  0xbe   : > { %3763 = vrot.lane.b32.xlu0 %v5122_v7, %s5610_s22  ;;  %5023 = vmatmul.mubr.msk.bf16.vlgmr.msra.gmra.mrb[24].mxu1 %vm352_vm1, %v6045_v25  ;;  %v1580_v19 = vsel %vm356_vm0, %v1487_v13, 0 }
  0xbf   : > { %v1437_v14 = vpop.permute.xlu1 %1436  ;;  %2077 = vmatprep.mubr.bf16.mxu1 %v5606_v0 }
  0xc0   : > { %v1481_v16 = vsel %vm1458_vm3, %v1435_v45, %v1437_v14  ;;  %v1482_v17 = vsel %vm1458_vm3, %v1437_v14, %v1439_v55  ;;  %v1451_v11 = vpop.permute.xlu0 %1450 }
  0xc1   : > { %v1562_v20 = vsel %vm356_vm0, %v1481_v16, 0  ;;  %v1488_v22 = vsel %vm1458_vm3, %v1449_v8, %v1451_v11  ;;  %5026 = vmatprep.subr.msk.bf16.mxu1 %vm356_vm0, %v1482_v17  ;;  %3769 = vrot.lane.b32.xlu1 %v5125_v12, %s5610_s22 }
  0xc2   : > { %3767 = vrot.lane.b32.xlu0 %v5124_v41, %s5610_s22  ;;  %5029 = vmatmul.mubr.msk.bf16.vlgmr.msra.gmra.mrb[16].mxu0 %vm352_vm1, %v6045_v25 }
  0xc3   : > { %5032 = vmatprep.subr.msk.bf16.mxu0 %vm356_vm0, %v1488_v22  ;;  %2046 = vmatpush1.bf16.msra.mxu1 %v1562_v20  ;;  %v1457_v26 = vpop.permute.xlu1 %1456 }
  0xc4   : > { %2169 = vmatpush1.bf16.msra.mxu0 %v1580_v19  ;;  %v1455_v30 = vpop.permute.xlu0 %1454  ;;  %2200 = vmatprep.mubr.bf16.mxu0 %v5606_v0 }
  0xc5   : > { %3773 = vrot.lane.b32.xlu1 %v5127_v44, %s5610_s22  ;;  %5189 = vmatprep.subr.bf16.mxu0 %v5608_v52  ;;  %v1491_v18 = vsel %vm1458_vm3, %v1455_v30, %v1457_v26 }
  0xc6   : > { %3771 = vrot.lane.b32.xlu0 %v5126_v24, %s5610_s22  ;;  %5027 = vmatmul.mubr.msk.bf16.vlgmr.msra.gmra.mrb[28].mxu1 %vm352_vm1, %v6045_v25  ;;  %v1592_v36 = vsel %vm356_vm0, %v1491_v18, 0 }
  0xc7   : > { %v2562_v32 = vpop.permute.xlu1 %2561  ;;  %2159 = vmatprep.mubr.bf16.mxu1 %v5606_v0 }
  0xc8   : > { %v1445_v35 = vpop.permute.xlu0 %1444 }
  0xc9   : > { %v1485_v38 = vsel %vm1458_vm3, %v1443_v1, %v1445_v35  ;;  %v1486_v39 = vsel %vm1458_vm3, %v1445_v35, %v1447_v6  ;;  %3777 = vrot.lane.b32.xlu1 %v5129_v31, %s5610_s22  ;;  %v5138_v6 = vcombine.low %v6039_v21, %v3594_v4 }
  0xca   : > { %v1574_v40 = vsel %vm356_vm0, %v1485_v38, 0  ;;  %3775 = vrot.lane.b32.xlu0 %v5128_v48, %s5610_s22  ;;  %5030 = vmatprep.subr.msk.bf16.mxu1 %vm356_vm0, %v1486_v39 }
  0xcb   : > { %5033 = vmatmul.mubr.msk.bf16.vlgmr.msra.gmra.mrb[20].mxu0 %vm352_vm1, %v6045_v25  ;;  %2128 = vmatpush1.bf16.msra.mxu1 %v1574_v40  ;;  %v2566_v42 = vpop.permute.xlu1 %2565 }
  0xcc   : > { %v2564_v43 = vpop.permute.xlu0 %2563  ;;  %5190 = vmatpush3.bf16.msra.mxu0 %v1592_v36  ;;  %5191 = vmatprep.mubr.msk.bf16.mxu0 %vm5609_vm2, %v5608_v52 }
  0xcd   : > { %v2630_v45 = vsel %vm1458_vm3, %v2564_v43, %v2566_v42  ;;  %3781 = vrot.lane.b32.xlu1 %v5131_v23, %s5610_s22  ;;  %v2629_v57 = vsel %vm1458_vm3, %v2562_v32, %v2564_v43 }
  0xce   : > { %3779 = vrot.lane.b32.xlu0 %v5130_v53, %s5610_s22  ;;  %5031 = vmatmul.mubr.msk.bf16.vlgmr.msra.gmra.mrb[32].mxu1 %vm352_vm1, %v6045_v25  ;;  %v2666_v51 = vsel %vm356_vm0, %v2629_v57, 0 }
  0xcf   : > { %v2570_v49 = vpop.permute.xlu1 %2569  ;;  %5072 = vmatprep.subr.msk.bf16.mxu0 %vm356_vm0, %v2630_v45  ;;  %2241 = vmatprep.mubr.bf16.mxu1 %v5606_v0 }
  0xd0   : > { %v1453_v50 = vpop.permute.xlu0 %1452 }
  0xd1   : > { %v1489_v54 = vsel %vm1458_vm3, %v1451_v11, %v1453_v50  ;;  %v1490_v55 = vsel %vm1458_vm3, %v1453_v50, %v1455_v30  ;;  %3785 = vrot.lane.b32.xlu1 %v5133_v46, %s5610_s22 }
  0xd2   : > { %v1586_v61 = vsel %vm356_vm0, %v1489_v54, 0  ;;  %3783 = vrot.lane.b32.xlu0 %v5132_v47, %s5610_s22  ;;  %5034 = vmatprep.subr.msk.bf16.mxu1 %vm356_vm0, %v1490_v55 }
  0xd3   : > { %5192 = vmatmul.mubr.msk.bf16.vlgmr.msra.gmra.mrb[24].mxu0 %vm352_vm1, %v6045_v25  ;;  %2210 = vmatpush1.bf16.msra.mxu1 %v1586_v61  ;;  %v2574_v33 = vpop.permute.xlu1 %2573 }
  0xd4   : > { %2765 = vmatpush1.bf16.msra.mxu0 %v2666_v51  ;;  %v2572_v60 = vpop.permute.xlu0 %2571  ;;  %2796 = vmatprep.mubr.bf16.mxu0 %v5606_v0 }
  0xd5   : > { %v2634_v62 = vsel %vm1458_vm3, %v2572_v60, %v2574_v33  ;;  %3789 = vrot.lane.b32.xlu1 %v5135_v56, %s5610_s22  ;;  %v2633_v1 = vsel %vm1458_vm3, %v2570_v49, %v2572_v60 }
  0xd6   : > { %3787 = vrot.lane.b32.xlu0 %v5134_v58, %s5610_s22  ;;  %5035 = vmatmul.mubr.msk.bf16.vlgmr.msra.gmra.mrb[36].mxu1 %vm352_vm1, %v6045_v25  ;;  %v2678_v7 = vsel %vm356_vm0, %v2633_v1, 0 }
  0xd7   : > { %v2578_v2 = vpop.permute.xlu1 %2577  ;;  %5076 = vmatprep.subr.msk.bf16.mxu0 %vm356_vm0, %v2634_v62  ;;  %2837 = vmatprep.mubr.bf16.mxu1 %v5606_v0 }
  0xd8   : > { %v2568_v5 = vpop.permute.xlu0 %2567 }
  0xd9   : > { %v2631_v8 = vsel %vm1458_vm3, %v2566_v42, %v2568_v5  ;;  %v2632_v25 = vsel %vm1458_vm3, %v2568_v5, %v2570_v49  ;;  %3793 = vrot.lane.b32.xlu1 %v5137_v63, %s5610_s22 }
  0xda   : > { %v2672_v9 = vsel %vm356_vm0, %v2631_v8, 0  ;;  %3791 = vrot.lane.b32.xlu0 %v5136_v3, %s5610_s22  ;;  %5074 = vmatprep.subr.msk.bf16.mxu1 %vm356_vm0, %v2632_v25 }
  0xdb   : > { %5073 = vmatmul.mubr.msk.bf16.vlgmr.msra.gmra.mrb[28].mxu0 %vm352_vm1, %v6261_v37  ;;  %2806 = vmatpush1.bf16.msra.mxu1 %v2672_v9  ;;  %v2582_v12 = vpop.permute.xlu1 %2581 }
  0xdc   : > { %2847 = vmatpush1.bf16.msra.mxu0 %v2678_v7  ;;  %v2580_v13 = vpop.permute.xlu0 %2579  ;;  %2878 = vmatprep.mubr.bf16.mxu0 %v5606_v0 }
  0xdd   : > { %v2638_v41 = vsel %vm1458_vm3, %v2580_v13, %v2582_v12  ;;  %3797 = vrot.lane.b32.xlu1 %v5139_v10, %s5610_s22  ;;  %v2637_v14 = vsel %vm1458_vm3, %v2578_v2, %v2580_v13 }
  0xde   : > { %3795 = vrot.lane.b32.xlu0 %v5138_v6, %s5610_s22  ;;  %5075 = vmatmul.mubr.msk.bf16.vlgmr.msra.gmra.mrb[4].mxu1 %vm352_vm1, %v6261_v37  ;;  %v2690_v16 = vsel %vm356_vm0, %v2637_v14, 0 }
  0xdf   : > { %v2586_v21 = vpop.permute.xlu1 %2585  ;;  %5080 = vmatprep.subr.msk.bf16.mxu0 %vm356_vm0, %v2638_v41  ;;  %2919 = vmatprep.mubr.bf16.mxu1 %v5606_v0 }
  0xe0   : > { %v2576_v15 = vpop.permute.xlu0 %2575 }
  0xe1   : > { %v2635_v17 = vsel %vm1458_vm3, %v2574_v33, %v2576_v15  ;;  %v2636_v11 = vsel %vm1458_vm3, %v2576_v15, %v2578_v2 }
  0xe2   : > { %v2684_v19 = vsel %vm356_vm0, %v2635_v17, 0  ;;  %5078 = vmatprep.subr.msk.bf16.mxu1 %vm356_vm0, %v2636_v11 }
  0xe3   : > { %5077 = vmatmul.mubr.msk.bf16.vlgmr.msra.gmra.mrb[32].mxu0 %vm352_vm1, %v6261_v37  ;;  %2888 = vmatpush1.bf16.msra.mxu1 %v2684_v19  ;;  %v2590_v20 = vpop.permute.xlu1 %2589 }
  0xe4   : > { %2929 = vmatpush1.bf16.msra.mxu0 %v2690_v16  ;;  %v2588_v22 = vpop.permute.xlu0 %2587  ;;  %2960 = vmatprep.mubr.bf16.mxu0 %v5606_v0 }
  0xe5   : > { %v2642_v44 = vsel %vm1458_vm3, %v2588_v22, %v2590_v20  ;;  %v2641_v24 = vsel %vm1458_vm3, %v2586_v21, %v2588_v22 }
  0xe6   : > { %5079 = vmatmul.mubr.msk.bf16.vlgmr.msra.gmra.mrb[12].mxu1 %vm352_vm1, %v6261_v37  ;;  %5084 = vmatprep.subr.msk.bf16.mxu0 %vm356_vm0, %v2642_v44  ;;  %v2702_v30 = vsel %vm356_vm0, %v2641_v24, 0 }
  0xe7   : > { %v2594_v26 = vpop.permute.xlu1 %2593  ;;  %3001 = vmatprep.mubr.bf16.mxu1 %v5606_v0 }
  0xe8   : > { %v2584_v27 = vpop.permute.xlu0 %2583 }
  0xe9   : > { %v2639_v31 = vsel %vm1458_vm3, %v2582_v12, %v2584_v27  ;;  %v2640_v18 = vsel %vm1458_vm3, %v2584_v27, %v2586_v21 }
  0xea   : > { %v2696_v48 = vsel %vm356_vm0, %v2639_v31, 0  ;;  %5082 = vmatprep.subr.msk.bf16.mxu1 %vm356_vm0, %v2640_v18 }
  0xeb   : > { %5081 = vmatmul.mubr.msk.bf16.vlgmr.msra.gmra.mrb[0].mxu0 %vm352_vm1, %v6261_v37  ;;  %2970 = vmatpush1.bf16.msra.mxu1 %v2696_v48  ;;  %v2598_v32 = vpop.permute.xlu1 %2597 }
  0xec   : > { %3011 = vmatpush1.bf16.msra.mxu0 %v2702_v30  ;;  %v2596_v34 = vpop.permute.xlu0 %2595  ;;  %3042 = vmatprep.mubr.bf16.mxu0 %v5606_v0 }
  0xed   : > { %v2646_v35 = vsel %vm1458_vm3, %v2596_v34, %v2598_v32  ;;  %v2645_v36 = vsel %vm1458_vm3, %v2594_v26, %v2596_v34 }
  0xee   : > { %5083 = vmatmul.mubr.msk.bf16.vlgmr.msra.gmra.mrb[16].mxu1 %vm352_vm1, %v6261_v37  ;;  %5088 = vmatprep.subr.msk.bf16.mxu0 %vm356_vm0, %v2646_v35  ;;  %v2714_v23 = vsel %vm356_vm0, %v2645_v36, 0 }
  0xef   : > { %v2602_v38 = vpop.permute.xlu1 %2601  ;;  %3083 = vmatprep.mubr.bf16.mxu1 %v5606_v0 }
  0xf0   : > { %v2592_v39 = vpop.permute.xlu0 %2591  ;;  %v6324_v57 = vpop.f32.mrb[0].mxu1 }
  0xf1   : > { %v2643_v40 = vsel %vm1458_vm3, %v2590_v20, %v2592_v39  ;;  %v2644_v53 = vsel %vm1458_vm3, %v2592_v39, %v2594_v26  ;;  %v6327_v49 = vpop.f32.mrb[1].mxu1 }
  0xf2   : > { %v2708_v42 = vsel %vm356_vm0, %v2643_v40, 0  ;;  %5086 = vmatprep.subr.msk.bf16.mxu1 %vm356_vm0, %v2644_v53  ;;  %v494_v50 = vpop.f32.mrb[2].mxu1 }
  0xf3   : > { %5085 = vmatmul.mubr.msk.bf16.vlgmr.msra.gmra.mrb[4].mxu0 %vm352_vm1, %v6261_v37  ;;  %3052 = vmatpush1.bf16.msra.mxu1 %v2708_v42  ;;  %v2606_v29 = vpop.permute.xlu1 %2605  ;;  %v495_v56 = vpop.f32.mrb[3].mxu1 }
  0xf4   : > { %3093 = vmatpush1.bf16.msra.mxu0 %v2714_v23  ;;  %v2604_v43 = vpop.permute.xlu0 %2603  ;;  %3124 = vmatprep.mubr.bf16.mxu0 %v5606_v0  ;;  %v6399_v23 = vld [vmem:[%s6564_s1 + $0xc] sm:$0xf] }
  0xf5   : > { %v2650_v45 = vsel %vm1458_vm3, %v2604_v43, %v2606_v29  ;;  %v2649_v46 = vsel %vm1458_vm3, %v2602_v38, %v2604_v43 }
  0xf6   : > { %5087 = vmatmul.mubr.msk.bf16.vlgmr.msra.gmra.mrb[20].mxu1 %vm352_vm1, %v6261_v37  ;;  %5092 = vmatprep.subr.msk.bf16.mxu0 %vm356_vm0, %v2650_v45  ;;  %v2726_v51 = vsel %vm356_vm0, %v2649_v46, 0 }
  0xf7   : > { %v2610_v47 = vpop.permute.xlu1 %2609  ;;  %3165 = vmatprep.mubr.bf16.mxu1 %v5606_v0 }
  0xf8   : > { %v2600_v28 = vpop.permute.xlu0 %2599 }
  0xf9   : > { %v2647_v54 = vsel %vm1458_vm3, %v2598_v32, %v2600_v28  ;;  %v2648_v55 = vsel %vm1458_vm3, %v2600_v28, %v2602_v38 }
  0xfa   : > { %v2720_v61 = vsel %vm356_vm0, %v2647_v54, 0  ;;  %5090 = vmatprep.subr.msk.bf16.mxu1 %vm356_vm0, %v2648_v55 }
  0xfb   : > { %5089 = vmatmul.mubr.msk.bf16.vlgmr.msra.gmra.mrb[8].mxu0 %vm352_vm1, %v6261_v37  ;;  %3134 = vmatpush1.bf16.msra.mxu1 %v2720_v61  ;;  %v2614_v58 = vpop.permute.xlu1 %2613 }
  0xfc   : > { %3175 = vmatpush1.bf16.msra.mxu0 %v2726_v51  ;;  %v2612_v33 = vpop.permute.xlu0 %2611  ;;  %3206 = vmatprep.mubr.bf16.mxu0 %v5606_v0 }
  0xfd   : > { %v2654_v59 = vsel %vm1458_vm3, %v2612_v33, %v2614_v58  ;;  %v2653_v60 = vsel %vm1458_vm3, %v2610_v47, %v2612_v33 }
  0xfe   : > { %5091 = vmatmul.mubr.msk.bf16.vlgmr.msra.gmra.mrb[24].mxu1 %vm352_vm1, %v6261_v37  ;;  %5096 = vmatprep.subr.msk.bf16.mxu0 %vm356_vm0, %v2654_v59  ;;  %v2738_v1 = vsel %vm356_vm0, %v2653_v60, 0 }
  0xff   : > { %v2618_v62 = vpop.permute.xlu1 %2617  ;;  %3247 = vmatprep.mubr.bf16.mxu1 %v5606_v0 }
 0x100   : > { %v2608_v63 = vpop.permute.xlu0 %2607  ;;  %v6356_v10 = vpop.f32.mrb[8].mxu1 }
 0x101   : > { %v2651_v3 = vsel %vm1458_vm3, %v2606_v29, %v2608_v63  ;;  %v2652_v2 = vsel %vm1458_vm3, %v2608_v63, %v2610_v47  ;;  %v6359_v6 = vpop.f32.mrb[9].mxu1 }
 0x102   : > { %v2732_v4 = vsel %vm356_vm0, %v2651_v3, 0  ;;  %5094 = vmatprep.subr.msk.bf16.mxu1 %vm356_vm0, %v2652_v2  ;;  %v576_v13 = vpop.f32.mrb[10].mxu1 }
 0x103   : > { %5093 = vmatmul.mubr.msk.bf16.vlgmr.msra.gmra.mrb[12].mxu0 %vm352_vm1, %v6261_v37  ;;  %3216 = vmatpush1.bf16.msra.mxu1 %v2732_v4  ;;  %v2622_v5 = vpop.permute.xlu1 %2621  ;;  %v577_v15 = vpop.f32.mrb[11].mxu1 }
 0x104   : > { %3257 = vmatpush1.bf16.msra.mxu0 %v2738_v1  ;;  %v2620_v7 = vpop.permute.xlu0 %2619  ;;  %3288 = vmatprep.mubr.bf16.mxu0 %v5606_v0 }
 0x105   : > { %v2658_v8 = vsel %vm1458_vm3, %v2620_v7, %v2622_v5  ;;  %v2657_v25 = vsel %vm1458_vm3, %v2618_v62, %v2620_v7 }
 0x106   : > { %5095 = vmatmul.mubr.msk.bf16.vlgmr.msra.gmra.mrb[28].mxu1 %vm352_vm1, %v6261_v37  ;;  %5100 = vmatprep.subr.msk.bf16.mxu0 %vm356_vm0, %v2658_v8  ;;  %v2750_v41 = vsel %vm356_vm0, %v2657_v25, 0 }
 0x107   : > { %v2626_v9 = vpop.permute.xlu1 %2625  ;;  %3329 = vmatprep.mubr.bf16.mxu1 %v5606_v0 }
 0x108   : > { %v2616_v12 = vpop.permute.xlu0 %2615 }
 0x109   : > { %v2655_v14 = vsel %vm1458_vm3, %v2614_v58, %v2616_v12  ;;  %v2656_v21 = vsel %vm1458_vm3, %v2616_v12, %v2618_v62 }
 0x10a   : > { %v2744_v16 = vsel %vm356_vm0, %v2655_v14, 0  ;;  %5098 = vmatprep.subr.msk.bf16.mxu1 %vm356_vm0, %v2656_v21 }
 0x10b   : > { %5097 = vmatmul.mubr.msk.bf16.vlgmr.msra.gmra.mrb[16].mxu0 %vm352_vm1, %v6261_v37  ;;  %3298 = vmatpush1.bf16.msra.mxu1 %v2744_v16  ;;  %v2624_v17 = vpop.permute.xlu1 %2623 }
 0x10c   : > { %3339 = vmatpush1.bf16.msra.mxu0 %v2750_v41  ;;  %v2659_v11 = vsel %vm1458_vm3, %v2622_v5, %v2624_v17  ;;  %v2660_v19 = vsel %vm1458_vm3, %v2624_v17, %v2626_v9  ;;  %v2628_v20 = vpop.permute.xlu0 %2627  ;;  %3370 = vmatprep.mubr.bf16.mxu0 %v5606_v0 }
 0x10d   : > { %v2756_v22 = vsel %vm356_vm0, %v2659_v11, 0  ;;  %5102 = vmatprep.subr.msk.bf16.mxu1 %vm356_vm0, %v2660_v19  ;;  %5195 = vmatprep.subr.bf16.mxu0 %v5608_v52  ;;  %v2661_v44 = vsel %vm1458_vm3, %v2626_v9, %v2628_v20 }
 0x10e   : > { %5099 = vmatmul.mubr.msk.bf16.vlgmr.msra.gmra.mrb[32].mxu1 %vm352_vm1, %v6261_v37  ;;  %v2762_v27 = vsel %vm356_vm0, %v2661_v44, 0 }
 0x10f   : > { %3380 = vmatpush1.bf16.msra.mxu1 %v2756_v22  ;;  %v3734_v24 = vpop.permute.xlu1 %3733  ;;  %3411 = vmatprep.mubr.bf16.mxu1 %v5606_v0 }
 0x110   : > { %v3732_v26 = vpop.permute.xlu0 %3731 }
 0x111   : > { %v3800_v32 = vsel %vm3799_vm4, %v3732_v26, %v3734_v24 }
 0x112   : > { %v3837_v38 = vsel %vm356_vm0, %v3800_v32, 0 }
 0x113   : > { %5101 = vmatmul.mubr.msk.bf16.vlgmr.msra.gmra.mrb[20].mxu0 %vm352_vm1, %v6261_v37  ;;  %v3738_v30 = vpop.permute.xlu1 %3737 }
 0x114   : > { %v3736_v31 = vpop.permute.xlu0 %3735  ;;  %5196 = vmatpush3.bf16.msra.mxu0 %v2762_v27  ;;  %5197 = vmatprep.mubr.msk.bf16.mxu0 %vm5609_vm2, %v5608_v52 }
 0x115   : > { %v3801_v18 = vsel %vm3799_vm4, %v3734_v24, %v3736_v31  ;;  %v3802_v48 = vsel %vm3799_vm4, %v3736_v31, %v3738_v30 }
 0x116   : > { %5103 = vmatmul.mubr.msk.bf16.vlgmr.msra.gmra.mrb[36].mxu1 %vm352_vm1, %v6261_v37  ;;  %5140 = vmatprep.subr.msk.bf16.mxu0 %vm356_vm0, %v3801_v18  ;;  %v3843_v35 = vsel %vm356_vm0, %v3802_v48, 0 }
 0x117   : > { %v3742_v34 = vpop.permute.xlu1 %3741  ;;  %4008 = vmatprep.mubr.bf16.mxu1 %v5606_v0 }
 0x118   : > { %v3740_v36 = vpop.permute.xlu0 %3739 }
 0x119   : > { %v3803_v39 = vsel %vm3799_vm4, %v3738_v30, %v3740_v36  ;;  %v3804_v43 = vsel %vm3799_vm4, %v3740_v36, %v3742_v34 }
 0x11a   : > { %5142 = vmatprep.subr.msk.bf16.mxu1 %vm356_vm0, %v3803_v39  ;;  %v3849_v47 = vsel %vm356_vm0, %v3804_v43, 0 }
 0x11b   : > { %5198 = vmatmul.mubr.msk.bf16.vlgmr.msra.gmra.mrb[24].mxu0 %vm352_vm1, %v6261_v37  ;;  %3977 = vmatpush1.bf16.msra.mxu1 %v3843_v35  ;;  %v3746_v40 = vpop.permute.xlu1 %3745 }
 0x11c   : > { %3936 = vmatpush1.bf16.msra.mxu0 %v3837_v38  ;;  %v3744_v53 = vpop.permute.xlu0 %3743  ;;  %3967 = vmatprep.mubr.bf16.mxu0 %v5606_v0 }
 0x11d   : > { %v3805_v42 = vsel %vm3799_vm4, %v3742_v34, %v3744_v53  ;;  %v3806_v29 = vsel %vm3799_vm4, %v3744_v53, %v3746_v40 }
 0x11e   : > { %5143 = vmatmul.mubr.msk.bf16.vlgmr.msra.gmra.mrb[4].mxu1 %vm352_vm1, %v6399_v23  ;;  %5144 = vmatprep.subr.msk.bf16.mxu0 %vm356_vm0, %v3805_v42  ;;  %v3855_v45 = vsel %vm356_vm0, %v3806_v29, 0 }
 0x11f   : > { %v3750_v37 = vpop.permute.xlu1 %3749  ;;  %4090 = vmatprep.mubr.bf16.mxu1 %v5606_v0 }
 0x120   : > { %v3748_v46 = vpop.permute.xlu0 %3747 }
 0x121   : > { %v3807_v28 = vsel %vm3799_vm4, %v3746_v40, %v3748_v46  ;;  %v3808_v56 = vsel %vm3799_vm4, %v3748_v46, %v3750_v37 }
 0x122   : > { %5146 = vmatprep.subr.msk.bf16.mxu1 %vm356_vm0, %v3807_v28  ;;  %v3861_v59 = vsel %vm356_vm0, %v3808_v56, 0 }
 0x123   : > { %5141 = vmatmul.mubr.msk.bf16.vlgmr.msra.gmra.mrb[28].mxu0 %vm352_vm1, %v6399_v23  ;;  %4059 = vmatpush1.bf16.msra.mxu1 %v3855_v45  ;;  %v3754_v50 = vpop.permute.xlu1 %3753 }
 0x124   : > { %4018 = vmatpush1.bf16.msra.mxu0 %v3849_v47  ;;  %v3752_v51 = vpop.permute.xlu0 %3751  ;;  %4049 = vmatprep.mubr.bf16.mxu0 %v5606_v0 }
 0x125   : > { %v3809_v54 = vsel %vm3799_vm4, %v3750_v37, %v3752_v51  ;;  %v3810_v55 = vsel %vm3799_vm4, %v3752_v51, %v3754_v50 }
 0x126   : > { %5147 = vmatmul.mubr.msk.bf16.vlgmr.msra.gmra.mrb[12].mxu1 %vm352_vm1, %v6399_v23  ;;  %5148 = vmatprep.subr.msk.bf16.mxu0 %vm356_vm0, %v3809_v54  ;;  %v3867_v58 = vsel %vm356_vm0, %v3810_v55, 0 }
 0x127   : > { %v3758_v61 = vpop.permute.xlu1 %3757  ;;  %4172 = vmatprep.mubr.bf16.mxu1 %v5606_v0 }
 0x128   : > { %v3756_v33 = vpop.permute.xlu0 %3755 }
 0x129   : > { %v3811_v60 = vsel %vm3799_vm4, %v3754_v50, %v3756_v33  ;;  %v3812_v2 = vsel %vm3799_vm4, %v3756_v33, %v3758_v61 }
 0x12a   : > { %5150 = vmatprep.subr.msk.bf16.mxu1 %vm356_vm0, %v3811_v60  ;;  %v3873_v8 = vsel %vm356_vm0, %v3812_v2, 0 }
 0x12b   : > { %5145 = vmatmul.mubr.msk.bf16.vlgmr.msra.gmra.mrb[32].mxu0 %vm352_vm1, %v6399_v23  ;;  %4141 = vmatpush1.bf16.msra.mxu1 %v3867_v58  ;;  %v3762_v62 = vpop.permute.xlu1 %3761 }
 0x12c   : > { %4100 = vmatpush1.bf16.msra.mxu0 %v3861_v59  ;;  %v3760_v63 = vpop.permute.xlu0 %3759  ;;  %4131 = vmatprep.mubr.bf16.mxu0 %v5606_v0 }
 0x12d   : > { %v3813_v1 = vsel %vm3799_vm4, %v3758_v61, %v3760_v63  ;;  %v3814_v3 = vsel %vm3799_vm4, %v3760_v63, %v3762_v62 }
 0x12e   : > { %5151 = vmatmul.mubr.msk.bf16.vlgmr.msra.gmra.mrb[16].mxu1 %vm352_vm1, %v6399_v23  ;;  %5152 = vmatprep.subr.msk.bf16.mxu0 %vm356_vm0, %v3813_v1  ;;  %v3879_v5 = vsel %vm356_vm0, %v3814_v3, 0 }
 0x12f   : > { %v3766_v4 = vpop.permute.xlu1 %3765  ;;  %4254 = vmatprep.mubr.bf16.mxu1 %v5606_v0 }
 0x130   : > { %v3764_v7 = vpop.permute.xlu0 %3763 }
 0x131   : > { %v3815_v25 = vsel %vm3799_vm4, %v3762_v62, %v3764_v7  ;;  %v3816_v14 = vsel %vm3799_vm4, %v3764_v7, %v3766_v4 }
 0x132   : > { %5154 = vmatprep.subr.msk.bf16.mxu1 %vm356_vm0, %v3815_v25  ;;  %v3885_v17 = vsel %vm356_vm0, %v3816_v14, 0 }
 0x133   : > { %5149 = vmatmul.mubr.msk.bf16.vlgmr.msra.gmra.mrb[0].mxu0 %vm352_vm1, %v6399_v23  ;;  %4223 = vmatpush1.bf16.msra.mxu1 %v3879_v5  ;;  %v3770_v9 = vpop.permute.xlu1 %3769 }
 0x134   : > { %4182 = vmatpush1.bf16.msra.mxu0 %v3873_v8  ;;  %v3768_v12 = vpop.permute.xlu0 %3767  ;;  %4213 = vmatprep.mubr.bf16.mxu0 %v5606_v0 }
 0x135   : > { %v3817_v13 = vsel %vm3799_vm4, %v3766_v4, %v3768_v12  ;;  %v3818_v41 = vsel %vm3799_vm4, %v3768_v12, %v3770_v9 }
 0x136   : > { %5155 = vmatmul.mubr.msk.bf16.vlgmr.msra.gmra.mrb[20].mxu1 %vm352_vm1, %v6399_v23  ;;  %5156 = vmatprep.subr.msk.bf16.mxu0 %vm356_vm0, %v3817_v13  ;;  %v3891_v15 = vsel %vm356_vm0, %v3818_v41, 0 }
 0x137   : > { %v3774_v21 = vpop.permute.xlu1 %3773  ;;  %4336 = vmatprep.mubr.bf16.mxu1 %v5606_v0 }
 0x138   : > { %v3772_v16 = vpop.permute.xlu0 %3771 }
 0x139   : > { %v3819_v11 = vsel %vm3799_vm4, %v3770_v9, %v3772_v16  ;;  %v3820_v24 = vsel %vm3799_vm4, %v3772_v16, %v3774_v21 }
 0x13a   : > { %5158 = vmatprep.subr.msk.bf16.mxu1 %vm356_vm0, %v3819_v11  ;;  %v3897_v31 = vsel %vm356_vm0, %v3820_v24, 0 }
 0x13b   : > { %5153 = vmatmul.mubr.msk.bf16.vlgmr.msra.gmra.mrb[4].mxu0 %vm352_vm1, %v6399_v23  ;;  %4305 = vmatpush1.bf16.msra.mxu1 %v3891_v15  ;;  %v3778_v19 = vpop.permute.xlu1 %3777 }
 0x13c   : > { %4264 = vmatpush1.bf16.msra.mxu0 %v3885_v17  ;;  %v3776_v20 = vpop.permute.xlu0 %3775  ;;  %4295 = vmatprep.mubr.bf16.mxu0 %v5606_v0 }
 0x13d   : > { %v3821_v22 = vsel %vm3799_vm4, %v3774_v21, %v3776_v20  ;;  %v3822_v44 = vsel %vm3799_vm4, %v3776_v20, %v3778_v19 }
 0x13e   : > { %5159 = vmatmul.mubr.msk.bf16.vlgmr.msra.gmra.mrb[24].mxu1 %vm352_vm1, %v6399_v23  ;;  %5160 = vmatprep.subr.msk.bf16.mxu0 %vm356_vm0, %v3821_v22  ;;  %v3903_v27 = vsel %vm356_vm0, %v3822_v44, 0 }
 0x13f   : > { %v3782_v26 = vpop.permute.xlu1 %3781  ;;  %4418 = vmatprep.mubr.bf16.mxu1 %v5606_v0 }
 0x140   : > { %v3780_v30 = vpop.permute.xlu0 %3779 }
 0x141   : > { %v3823_v18 = vsel %vm3799_vm4, %v3778_v19, %v3780_v30  ;;  %v3824_v36 = vsel %vm3799_vm4, %v3780_v30, %v3782_v26 }
 0x142   : > { %5162 = vmatprep.subr.msk.bf16.mxu1 %vm356_vm0, %v3823_v18  ;;  %v3909_v53 = vsel %vm356_vm0, %v3824_v36, 0 }
 0x143   : > { %5157 = vmatmul.mubr.msk.bf16.vlgmr.msra.gmra.mrb[8].mxu0 %vm352_vm1, %v6399_v23  ;;  %4387 = vmatpush1.bf16.msra.mxu1 %v3903_v27  ;;  %v3786_v48 = vpop.permute.xlu1 %3785 }
 0x144   : > { %4346 = vmatpush1.bf16.msra.mxu0 %v3897_v31  ;;  %v3784_v32 = vpop.permute.xlu0 %3783  ;;  %4377 = vmatprep.mubr.bf16.mxu0 %v5606_v0 }
 0x145   : > { %v3825_v34 = vsel %vm3799_vm4, %v3782_v26, %v3784_v32  ;;  %v3826_v35 = vsel %vm3799_vm4, %v3784_v32, %v3786_v48 }
 0x146   : > { %5163 = vmatmul.mubr.msk.bf16.vlgmr.msra.gmra.mrb[28].mxu1 %vm352_vm1, %v6399_v23  ;;  %5164 = vmatprep.subr.msk.bf16.mxu0 %vm356_vm0, %v3825_v34  ;;  %v3915_v39 = vsel %vm356_vm0, %v3826_v35, 0 }
 0x147   : > { %v3790_v38 = vpop.permute.xlu1 %3789  ;;  %4500 = vmatprep.mubr.bf16.mxu1 %v5606_v0 }
 0x148   : > { %v3788_v40 = vpop.permute.xlu0 %3787 }
 0x149   : > { %v3827_v42 = vsel %vm3799_vm4, %v3786_v48, %v3788_v40  ;;  %v3828_v46 = vsel %vm3799_vm4, %v3788_v40, %v3790_v38 }
 0x14a   : > { %5166 = vmatprep.subr.msk.bf16.mxu1 %vm356_vm0, %v3827_v42  ;;  %v3921_v50 = vsel %vm356_vm0, %v3828_v46, 0 }
 0x14b   : > { %5161 = vmatmul.mubr.msk.bf16.vlgmr.msra.gmra.mrb[12].mxu0 %vm352_vm1, %v6399_v23  ;;  %4469 = vmatpush1.bf16.msra.mxu1 %v3915_v39  ;;  %v3794_v29 = vpop.permute.xlu1 %3793 }
 0x14c   : > { %4428 = vmatpush1.bf16.msra.mxu0 %v3909_v53  ;;  %v3792_v43 = vpop.permute.xlu0 %3791  ;;  %4459 = vmatprep.mubr.bf16.mxu0 %v5606_v0 }
 0x14d   : > { %v3829_v37 = vsel %vm3799_vm4, %v3790_v38, %v3792_v43  ;;  %v3830_v45 = vsel %vm3799_vm4, %v3792_v43, %v3794_v29 }
 0x14e   : > { %5167 = vmatmul.mubr.msk.bf16.vlgmr.msra.gmra.mrb[32].mxu1 %vm352_vm1, %v6399_v23  ;;  %5168 = vmatprep.subr.msk.bf16.mxu0 %vm356_vm0, %v3829_v37  ;;  %v3927_v47 = vsel %vm356_vm0, %v3830_v45, 0 }
 0x14f   : > { %4582 = vmatprep.mubr.bf16.mxu1 %v5606_v0  ;;  %v3798_v54 = vpop.permute.xlu1 %3797 }
 0x150   : > { %v3796_v28 = vpop.permute.xlu0 %3795 }
 0x151   : > { %v3831_v51 = vsel %vm3799_vm4, %v3794_v29, %v3796_v28  ;;  %v3832_v55 = vsel %vm3799_vm4, %v3796_v28, %v3798_v54 }
 0x152   : > { %5170 = vmatprep.subr.msk.bf16.mxu1 %vm356_vm0, %v3831_v51  ;;  %v3933_v56 = vsel %vm356_vm0, %v3832_v55, 0 }
 0x153   : > { %5165 = vmatmul.mubr.msk.bf16.vlgmr.msra.gmra.mrb[16].mxu0 %vm352_vm1, %v6399_v23  ;;  %4551 = vmatpush1.bf16.msra.mxu1 %v3927_v47 }
 0x154   : > { %4510 = vmatpush1.bf16.msra.mxu0 %v3921_v50  ;;  %4541 = vmatprep.mubr.bf16.mxu0 %v5606_v0 }
 0x155   : > { %5201 = vmatprep.subr.bf16.mxu0 %v5608_v52 }
 0x156   : > { %5171 = vmatmul.mubr.msk.bf16.vlgmr.msra.gmra.mrb[36].mxu1 %vm352_vm1, %v6399_v23 }
 0x15b   : > { %5169 = vmatmul.mubr.msk.bf16.vlgmr.msra.gmra.mrb[20].mxu0 %vm352_vm1, %v6399_v23 }
 0x15c   : > { %5202 = vmatpush3.bf16.msra.mxu0 %v3933_v56  ;;  %5203 = vmatprep.mubr.msk.bf16.mxu0 %vm5609_vm2, %v5608_v52 }
 0x163   : > { %5204 = vmatmul.mubr.msk.bf16.vlgmr.msra.gmra.mrb[24].mxu0 %vm352_vm1, %v6399_v23 }
 0x1f1   : > { %v4010_v0 = vpop.f32.mrb[4].mxu1 }
 0x1f2   : > { %v4732_v61 = vmax.f32 %v4010_v0, 0.0  ;;  %v4012_v58 = vpop.f32.mrb[5].mxu1 }
 0x1f3   : > { %v4733_v33 = vmax.f32 %v4012_v58, 0.0  ;;  %v4014_v59 = vpop.f32.mrb[6].mxu1 }
 0x1f4   : > { %4765 = vst [vmem:[%s6515_s30 + $0x10] sm:$0xff] %v4732_v61  ;;  %v4015_v60 = vpop.f32.mrb[7].mxu1 }
 0x1f5   : > { %4766 = vst [vmem:[%s6515_s30 + $0x18] sm:$0xff] %v4733_v33 }
 0x1f6   : > { %v3969_v52 = vpop.f32.mrb[28].mxu0 }
 0x1f7   : > { %v5209_v23 = vadd.f32 %v3969_v52, %v6324_v57  ;;  %v3971_v62 = vpop.f32.mrb[29].mxu0 }
 0x1f8   : > { %v5212_v63 = vadd.f32 %v3971_v62, %v6327_v49  ;;  %v3973_v1 = vpop.f32.mrb[30].mxu0 }
 0x1f9   : > { %v4730_v3 = vmax.f32 %v5209_v23, 0.0  ;;  %v3974_v2 = vpop.f32.mrb[31].mxu0  ;;  %v4092_v4 = vpop.f32.mrb[12].mxu1 }
 0x1fa   : > { %v4731_v5 = vmax.f32 %v5212_v63, 0.0  ;;  %v4736_v7 = vmax.f32 %v4092_v4, 0.0  ;;  %v4094_v8 = vpop.f32.mrb[13].mxu1 }
 0x1fb   : > { %4763 = vst [vmem:[%s6515_s30] sm:$0xff] %v4730_v3  ;;  %v4737_v25 = vmax.f32 %v4094_v8, 0.0  ;;  %v4096_v9 = vpop.f32.mrb[14].mxu1 }
 0x1fc   : > { %4764 = vst [vmem:[%s6515_s30 + $0x8] sm:$0xff] %v4731_v5  ;;  %4769 = vst [vmem:[%s6515_s30 + $0x30] sm:$0xff] %v4736_v7  ;;  %v4097_v12 = vpop.f32.mrb[15].mxu1 }
 0x1fd   : > { %4770 = vst [vmem:[%s6515_s30 + $0x38] sm:$0xff] %v4737_v25 }
 0x1fe   : > { %v4051_v57 = vpop.f32.mrb[32].mxu0 }
 0x1ff   : > { %v5215_v49 = vadd.f32 %v4051_v57, %v6356_v10  ;;  %v4053_v13 = vpop.f32.mrb[33].mxu0 }
 0x200   : > { %v5218_v41 = vadd.f32 %v4053_v13, %v6359_v6  ;;  %v4055_v14 = vpop.f32.mrb[34].mxu0 }
 0x201   : > { %v4734_v21 = vmax.f32 %v5215_v49, 0.0  ;;  %v4056_v15 = vpop.f32.mrb[35].mxu0  ;;  %v4174_v16 = vpop.f32.mrb[16].mxu1 }
 0x202   : > { %v4735_v17 = vmax.f32 %v5218_v41, 0.0  ;;  %v4740_v11 = vmax.f32 %v4174_v16, 0.0  ;;  %v4176_v19 = vpop.f32.mrb[17].mxu1 }
 0x203   : > { %4767 = vst [vmem:[%s6515_s30 + $0x20] sm:$0xff] %v4734_v21  ;;  %v4741_v20 = vmax.f32 %v4176_v19, 0.0  ;;  %v4178_v22 = vpop.f32.mrb[18].mxu1 }
 0x204   : > { %4768 = vst [vmem:[%s6515_s30 + $0x28] sm:$0xff] %v4735_v17  ;;  %4773 = vst [vmem:[%s6515_s30 + $0x50] sm:$0xff] %v4740_v11  ;;  %v4179_v10 = vpop.f32.mrb[19].mxu1 }
 0x205   : > { %4774 = vst [vmem:[%s6515_s30 + $0x58] sm:$0xff] %v4741_v20 }
 0x206   : > { %v4133_v44 = vpop.f32.mrb[0].mxu0 }
 0x207   : > { %v4738_v6 = vmax.f32 %v4133_v44, 0.0  ;;  %v4135_v24 = vpop.f32.mrb[1].mxu0 }
 0x208   : > { %v4739_v26 = vmax.f32 %v4135_v24, 0.0  ;;  %v4137_v27 = vpop.f32.mrb[2].mxu0 }
 0x209   : > { %4771 = vst [vmem:[%s6515_s30 + $0x40] sm:$0xff] %v4738_v6  ;;  %v4138_v30 = vpop.f32.mrb[3].mxu0  ;;  %v4256_v31 = vpop.f32.mrb[20].mxu1 }
 0x20a   : > { %4772 = vst [vmem:[%s6515_s30 + $0x48] sm:$0xff] %v4739_v26  ;;  %v4744_v18 = vmax.f32 %v4256_v31, 0.0  ;;  %v4258_v48 = vpop.f32.mrb[21].mxu1 }
 0x20b   : > { %v4745_v32 = vmax.f32 %v4258_v48, 0.0  ;;  %v4260_v34 = vpop.f32.mrb[22].mxu1 }
 0x20c   : > { %4777 = vst [vmem:[%s6515_s30 + $0x70] sm:$0xff] %v4744_v18  ;;  %v4261_v35 = vpop.f32.mrb[23].mxu1 }
 0x20d   : > { %4778 = vst [vmem:[%s6515_s30 + $0x78] sm:$0xff] %v4745_v32 }
 0x20e   : > { %v4215_v36 = vpop.f32.mrb[4].mxu0 }
 0x20f   : > { %v4742_v38 = vmax.f32 %v4215_v36, 0.0  ;;  %v4217_v39 = vpop.f32.mrb[5].mxu0 }
 0x210   : > { %v4743_v40 = vmax.f32 %v4217_v39, 0.0  ;;  %v4219_v53 = vpop.f32.mrb[6].mxu0 }
 0x211   : > { %4775 = vst [vmem:[%s6515_s30 + $0x60] sm:$0xff] %v4742_v38  ;;  %v4220_v42 = vpop.f32.mrb[7].mxu0  ;;  %v4338_v29 = vpop.f32.mrb[24].mxu1 }
 0x212   : > { %4776 = vst [vmem:[%s6515_s30 + $0x68] sm:$0xff] %v4743_v40  ;;  %v4748_v43 = vmax.f32 %v4338_v29, 0.0  ;;  %v4340_v37 = vpop.f32.mrb[25].mxu1 }
 0x213   : > { %v4749_v45 = vmax.f32 %v4340_v37, 0.0  ;;  %v4342_v46 = vpop.f32.mrb[26].mxu1 }
 0x214   : > { %4781 = vst [vmem:[%s6515_s30 + $0x90] sm:$0xff] %v4748_v43  ;;  %v4343_v47 = vpop.f32.mrb[27].mxu1 }
 0x215   : > { %4782 = vst [vmem:[%s6515_s30 + $0x98] sm:$0xff] %v4749_v45 }
 0x216   : > { %v4297_v28 = vpop.f32.mrb[8].mxu0 }
 0x217   : > { %v4746_v50 = vmax.f32 %v4297_v28, 0.0  ;;  %v4299_v51 = vpop.f32.mrb[9].mxu0 }
 0x218   : > { %v4747_v54 = vmax.f32 %v4299_v51, 0.0  ;;  %v4301_v55 = vpop.f32.mrb[10].mxu0 }
 0x219   : > { %4779 = vst [vmem:[%s6515_s30 + $0x80] sm:$0xff] %v4746_v50  ;;  %v4302_v56 = vpop.f32.mrb[11].mxu0  ;;  %v4420_v0 = vpop.f32.mrb[28].mxu1 }
 0x21a   : > { %4780 = vst [vmem:[%s6515_s30 + $0x88] sm:$0xff] %v4747_v54  ;;  %v4752_v61 = vmax.f32 %v4420_v0, 0.0  ;;  %v4422_v58 = vpop.f32.mrb[29].mxu1 }
 0x21b   : > { %v4753_v33 = vmax.f32 %v4422_v58, 0.0  ;;  %v4424_v59 = vpop.f32.mrb[30].mxu1 }
 0x21c   : > { %4785 = vst [vmem:[%s6515_s30 + $0xb0] sm:$0xff] %v4752_v61  ;;  %v4425_v60 = vpop.f32.mrb[31].mxu1 }
 0x21d   : > { %4786 = vst [vmem:[%s6515_s30 + $0xb8] sm:$0xff] %v4753_v33 }
 0x21e   : > { %v4379_v52 = vpop.f32.mrb[12].mxu0 }
 0x21f   : > { %v4750_v23 = vmax.f32 %v4379_v52, 0.0  ;;  %v4381_v62 = vpop.f32.mrb[13].mxu0 }
 0x220   : > { %v4751_v63 = vmax.f32 %v4381_v62, 0.0  ;;  %v4383_v1 = vpop.f32.mrb[14].mxu0 }
 0x221   : > { %4783 = vst [vmem:[%s6515_s30 + $0xa0] sm:$0xff] %v4750_v23  ;;  %v4384_v3 = vpop.f32.mrb[15].mxu0  ;;  %v4502_v2 = vpop.f32.mrb[32].mxu1 }
 0x222   : > { %4784 = vst [vmem:[%s6515_s30 + $0xa8] sm:$0xff] %v4751_v63  ;;  %v4756_v4 = vmax.f32 %v4502_v2, 0.0  ;;  %v4504_v5 = vpop.f32.mrb[33].mxu1 }
 0x223   : > { %v4757_v7 = vmax.f32 %v4504_v5, 0.0  ;;  %v4506_v8 = vpop.f32.mrb[34].mxu1 }
 0x224   : > { %4789 = vst [vmem:[%s6515_s30 + $0xd0] sm:$0xff] %v4756_v4  ;;  %v4507_v25 = vpop.f32.mrb[35].mxu1 }
 0x225   : > { %4790 = vst [vmem:[%s6515_s30 + $0xd8] sm:$0xff] %v4757_v7 }
 0x226   : > { %v4461_v9 = vpop.f32.mrb[16].mxu0 }
 0x227   : > { %v4754_v12 = vmax.f32 %v4461_v9, 0.0  ;;  %v4463_v57 = vpop.f32.mrb[17].mxu0 }
 0x228   : > { %v4755_v49 = vmax.f32 %v4463_v57, 0.0  ;;  %v4465_v13 = vpop.f32.mrb[18].mxu0 }
 0x229   : > { %4787 = vst [vmem:[%s6515_s30 + $0xc0] sm:$0xff] %v4754_v12  ;;  %v4466_v41 = vpop.f32.mrb[19].mxu0  ;;  %v4584_v14 = vpop.f32.mrb[36].mxu1 }
 0x22a   : > { %4788 = vst [vmem:[%s6515_s30 + $0xc8] sm:$0xff] %v4755_v49  ;;  %v4760_v21 = vmax.f32 %v4584_v14, 0.0  ;;  %v4586_v15 = vpop.f32.mrb[37].mxu1 }
 0x22b   : > { %v4761_v16 = vmax.f32 %v4586_v15, 0.0  ;;  %v4588_v17 = vpop.f32.mrb[38].mxu1 }
 0x22c   : > { %4793 = vst [vmem:[%s6515_s30 + $0xf0] sm:$0xff] %v4760_v21  ;;  %v4589_v11 = vpop.f32.mrb[39].mxu1 }
 0x22d   : > { %4794 = vst [vmem:[%s6515_s30 + $0xf8] sm:$0xff] %v4761_v16 }
 0x22e   : > { %v4543_v19 = vpop.f32.mrb[20].mxu0 }
 0x22f   : > { %v4758_v20 = vmax.f32 %v4543_v19, 0.0  ;;  %v4545_v22 = vpop.f32.mrb[21].mxu0 }
 0x230   : > { %v4759_v10 = vmax.f32 %v4545_v22, 0.0  ;;  %v4547_v44 = vpop.f32.mrb[22].mxu0 }
 0x231   : > { %4791 = vst [vmem:[%s6515_s30 + $0xe0] sm:$0xff] %v4758_v20  ;;  %v4548_v6 = vpop.f32.mrb[23].mxu0 }
 0x232   : > { %4792 = vst [vmem:[%s6515_s30 + $0xe8] sm:$0xff] %v4759_v10 }
 0x236   : > { %v4625_v24 = vpop.f32.mrb[24].mxu0 }
 0x237   : > { %v4762_v26 = vmax.f32 %v4625_v24, 0.0  ;;  %v5205_v27 = vpop.f32.mrb[25].mxu0 }
 0x238   : > { %v4628_v30 = vpop.f32.mrb[26].mxu0 }
 0x239   : > { %4795 = vst [vmem:[%s6515_s30 + $0x100] sm:$0xff] %v4762_v26  ;;  %v5206_v31 = vpop.f32.mrb[27].mxu0 }
 0x23a PF: > { %s12_s11 = sadd.s32 1, %s5604_s11   ;;  %s6566_s9 = smov %s5600_s10 }
 0x23b   : > { %p9_p5 = scmp.ge.s32.totalorder %s12_s11, 6   ;;  %s6567_s10 = smov %s6569_s12 }
 0x23d   :  { %11 = sbr.rel (!%p9_p5) target bundleno = 2 (0x2), region = 64 }

</bundles_post_ra>
